<compile_context>
chip_gen: v7x
topology: tpu7x:2x2x1
jax: 0.10.0
libtpu: 0.0.40
codegen_flags: <defaults>
</compile_context>

<pallas_src>
import math
import functools

import jax
import jax.numpy as jnp
from jax.experimental import pallas as pl
from jax.experimental.pallas import tpu as pltpu


def decoder_layer_kernel(*refs, num_heads, mask_mode, kv_tile):
    if mask_mode == "dense":
        x_ref, enc_ref, bias_ref = refs[0], refs[1], refs[2]
        w_refs = refs[3:-1]
    else:
        x_ref, enc_ref = refs[0], refs[1]
        bias_ref = None
        w_refs = refs[2:-1]
    o_ref = refs[-1]
    (wqkv_ref, bqkv_ref, wo_ref, bo_ref,
     g1_ref, be1_ref, g2_ref, be2_ref,
     w1_ref, b1_ref, w2_ref, b2_ref) = w_refs

    Bt, Sq, D = x_ref.shape
    Se = enc_ref.shape[1]
    H = num_heads
    dk = D // H
    scale = 1.0 / math.sqrt(dk)
    cdt = wqkv_ref.dtype          # MXU input dtype (bf16 in production, f32 for checks)

    x = x_ref[...].reshape(Bt * Sq, D)      # already compute dtype (cast in wrapper)
    enc = enc_ref[...].reshape(Bt * Se, D)

    wqkv = wqkv_ref[...]                    # (D, 3D)  [wq | wk | wv]
    bqkv = bqkv_ref[...]                    # (1, 3D)  f32
    wo = wo_ref[...]
    bo = bo_ref[...]

    # TODO(synk): split/merge_heads still emit a sublane relayout (transpose of the two
    # middle dims); with head_dim >= 128 at config time (or head-packed block-diagonal
    # weights / pltpu.einshape) these XLU passes could be removed for better MXU fill.
    def split_heads(t2d):                   # (Bt*s, D) f32 -> (Bt*H, s, dk) compute dtype
        s = t2d.shape[0] // Bt
        t = t2d.astype(cdt).reshape(Bt, s, H, dk).transpose(0, 2, 1, 3)
        return t.reshape(Bt * H, s, dk)

    def merge_heads(t3d):                   # (Bt*H, s, dk) -> (Bt*s, D) compute dtype
        s = t3d.shape[1]
        t = t3d.astype(cdt).reshape(Bt, H, s, dk).transpose(0, 2, 1, 3)
        return t.reshape(Bt * s, D)

    def attention(q2d, k2d, v2d, bias_fn):
        """Flash-style attention: online softmax over KV chunks, so the full
        (Bt*H, Sq, Sk) score tensor is never materialized."""
        q, k, v = split_heads(q2d), split_heads(k2d), split_heads(v2d)
        Sk = k.shape[1]
        # TODO(synk): ragged Sk (not a multiple of kv_tile) falls back to one chunk; pad
        # Sk or add a masked tail chunk for production shapes that are not multiples.
        kv_t = kv_tile if (Sk > kv_tile and Sk % kv_tile == 0) else Sk
        n_chunks = Sk // kv_t

        m = l = acc = None
        for ci in range(n_chunks):          # static unroll; carries chain the live ranges
            c0 = ci * kv_t
            k_c = k[:, c0:c0 + kv_t, :]
            v_c = v[:, c0:c0 + kv_t, :]
            s = jnp.einsum('nqd,nkd->nqk', q, k_c,
                           preferred_element_type=jnp.float32) * scale
            if bias_fn is not None:
                s = s + bias_fn(c0, kv_t)[None, :, :]
            m_c = jnp.max(s, axis=-1, keepdims=True)
            if m is None:                   # first chunk: initialize running statistics
                m_new = m_c
                p = jnp.exp(s - m_new)
                l = jnp.sum(p, axis=-1, keepdims=True)
                acc = jnp.einsum('nqk,nkd->nqd', p.astype(cdt), v_c,
                                 preferred_element_type=jnp.float32)
            else:
                m_new = jnp.maximum(m, m_c)
                alpha = jnp.exp(m - m_new)
                p = jnp.exp(s - m_new)
                l = alpha * l + jnp.sum(p, axis=-1, keepdims=True)
                acc = alpha * acc + jnp.einsum('nqk,nkd->nqd', p.astype(cdt), v_c,
                                               preferred_element_type=jnp.float32)
            m = m_new
        # Deferred normalization: scale the (n,Sq,dk) accumulator, not the (n,Sq,Sk) probs.
        ctx = acc * pl.reciprocal(l, approx=True)
        out = merge_heads(ctx)
        return jnp.dot(out, wo, preferred_element_type=jnp.float32) + bo

    def layernorm(z, gamma, beta):          # f32 elementwise math (v5e-friendly)
        mu = jnp.mean(z, axis=-1, keepdims=True)
        var = jnp.mean(jnp.square(z - mu), axis=-1, keepdims=True)
        return (z - mu) * jax.lax.rsqrt(var + 1e-5) * gamma + beta

    # Additive mask bias for the self-attention, built per KV chunk.
    if mask_mode == "causal":
        def self_bias(c0, kv_t):            # generated in-kernel, no HBM/VMEM bias array
            row = jax.lax.broadcasted_iota(jnp.int32, (Sq, kv_t), 0)
            col = jax.lax.broadcasted_iota(jnp.int32, (Sq, kv_t), 1) + c0
            return jnp.where(col > row, -1e9, 0.0).astype(jnp.float32)
    elif mask_mode == "dense":
        def self_bias(c0, kv_t):
            return bias_ref[:, c0:c0 + kv_t]
    else:
        self_bias = None

    # --- self-attention: single fused QKV projection (one MXU pass, N = 3D) ---
    qkv = jnp.dot(x, wqkv, preferred_element_type=jnp.float32) + bqkv
    a1 = attention(qkv[:, :D], qkv[:, D:2 * D], qkv[:, 2 * D:], self_bias)
    n1 = layernorm(a1, g1_ref[...], be1_ref[...])

    # --- cross-attention (same MHA weights): Q from n1, fused KV from the encoder ---
    q2 = jnp.dot(n1.astype(cdt), wqkv[:, :D],
                 preferred_element_type=jnp.float32) + bqkv[:, :D]
    kv = jnp.dot(enc, wqkv[:, D:],
                 preferred_element_type=jnp.float32) + bqkv[:, D:]
    a2 = attention(q2, kv[:, :D], kv[:, D:], None)
    n2 = layernorm(a2, g2_ref[...], be2_ref[...])

    # --- feed-forward (hidden cast to MXU dtype right after ReLU: no live f32 copy) ---
    h1 = jnp.maximum(
        jnp.dot(n2.astype(cdt), w1_ref[...],
                preferred_element_type=jnp.float32) + b1_ref[...], 0.0).astype(cdt)
    ff = jnp.dot(h1, w2_ref[...],
                 preferred_element_type=jnp.float32) + b2_ref[...]

    o_ref[...] = ff.reshape(Bt, Sq, D).astype(o_ref.dtype)


def _weight_spec(a):
    nd = a.ndim

    def idx_map(b):
        return (0,) * nd

    # Constant block index: DMA'd once, stays resident across grid steps. Buffered(1)
    # avoids the default double-buffer reserving 2x the weight footprint in VMEM
    # (critical on v7x's 64 MiB).
    try:
        return pl.BlockSpec(a.shape, idx_map, pipeline_mode=pl.Buffered(1))
    except Exception:
        return pl.BlockSpec(a.shape, idx_map)


def _vmem_limit_bytes():
    cap = 128 * 1024 * 1024
    try:
        cap = int(getattr(pltpu.get_tpu_info(), "vmem_capacity_bytes", cap)) or cap
    except Exception:
        pass
    # ~100 MiB usable on v5e/v6e (128 MiB physical), ~56 MiB on v7x (64 MiB physical).
    return int(min(100 * 1024 * 1024, cap * 7 // 8))


def decoder_layer(x, enc, mask, params, num_heads, *,
                  batch_block=None, compute_dtype=jnp.bfloat16, out_dtype=None,
                  causal_mask=False, kv_tile=512):
    B, S, D = x.shape
    Be, Se, De = enc.shape
    assert Be == B and De == D and D % num_heads == 0
    out_dtype = compute_dtype if out_dtype is None else out_dtype

    # Fused QKV weight / bias. Weights go to the MXU in compute_dtype (bf16 halves DMA +
    # VMEM residency); biases / LayerNorm params stay f32 (added to f32 accumulators).
    # TODO(synk): on v7x, fp8 weight storage (bf16 activations) would halve residency again.
    wqkv = jnp.concatenate([params['wq'], params['wk'], params['wv']],
                           axis=1).astype(compute_dtype)
    bqkv = jnp.concatenate([params['bq'], params['bk'], params['bv']],
                           axis=1).astype(jnp.float32)

    weights = [
        wqkv, bqkv,
        params['wo'].astype(compute_dtype), params['bo'].astype(jnp.float32),
        params['g1'].astype(jnp.float32), params['be1'].astype(jnp.float32),
        params['g2'].astype(jnp.float32), params['be2'].astype(jnp.float32),
        params['w1'].astype(compute_dtype), params['b1'].astype(jnp.float32),
        params['w2'].astype(compute_dtype), params['b2'].astype(jnp.float32),
    ]

    # Mask handling: causal masks are rebuilt in-kernel from iota (no (S,S) DMA / VMEM
    # residency); arbitrary masks fall back to a DMA'd additive f32 bias.
    if mask is None:
        mask_mode, extra_inputs, extra_specs = "none", [], []
    elif causal_mask:
        mask_mode, extra_inputs, extra_specs = "causal", [], []
    else:
        mask_mode = "dense"
        bias = jnp.where(mask == 0, -1e9, 0.0).astype(jnp.float32)
        extra_inputs, extra_specs = [bias], [_weight_spec(bias)]

    # Batch-block heuristic: target ~512 matmul rows per grid step (fills v5e's 4x128^2
    # MXUs, >=256 on v6e/v7x) but keep >=2 grid steps so the "parallel" batch axis can
    # shard across v7x's two TensorCores.
    if batch_block is None:
        target_rows = 512
        batch_block = 1
        for cand in range(1, B + 1):
            if B % cand == 0 and cand * S <= target_rows:
                batch_block = cand
        while batch_block > 1 and B // batch_block < 2:
            batch_block = max(c for c in range(1, batch_block) if B % c == 0)
    Bt = batch_block
    assert B % Bt == 0
    grid = (B // Bt,)

    kernel = functools.partial(decoder_layer_kernel, num_heads=num_heads,
                               mask_mode=mask_mode, kv_tile=kv_tile)

    return pl.pallas_call(
        kernel,
        out_shape=jax.ShapeDtypeStruct((B, S, D), out_dtype),
        grid_spec=pltpu.PrefetchScalarGridSpec(
            num_scalar_prefetch=0,
            grid=grid,
            in_specs=[pl.BlockSpec((Bt, S, D), lambda b: (b, 0, 0)),
                      pl.BlockSpec((Bt, Se, D), lambda b: (b, 0, 0))]
                     + extra_specs
                     + [_weight_spec(a) for a in weights],
            out_specs=pl.BlockSpec((Bt, S, D), lambda b: (b, 0, 0)),
        ),
        compiler_params=pltpu.CompilerParams(
            dimension_semantics=("parallel",),   # independent batch axis -> both v7x TCs
            vmem_limit_bytes=_vmem_limit_bytes(),
        ),
    )(x.astype(compute_dtype), enc.astype(compute_dtype), *extra_inputs, *weights)


def reference_decoder_layer(x, enc, mask, params, num_heads):
    """Pure-JAX f32 reference matching the PyTorch forward semantics (eval mode)."""
    B, S, D = x.shape
    d_k = D // num_heads
    p = params

    def mha(q_in, k_in, v_in, m):
        def heads(t):
            return t.reshape(B, -1, num_heads, d_k).transpose(0, 2, 1, 3)
        q = heads(q_in @ p['wq'] + p['bq'])
        k = heads(k_in @ p['wk'] + p['bk'])
        v = heads(v_in @ p['wv'] + p['bv'])
        scores = jnp.einsum('bhqd,bhkd->bhqk', q, k) / math.sqrt(d_k)
        if m is not None:
            scores = jnp.where(m[None, None] == 0, -1e9, scores)
        attn = jax.nn.softmax(scores, axis=-1)
        o = jnp.einsum('bhqk,bhkd->bhqd', attn, v).transpose(0, 2, 1, 3).reshape(B, -1, D)
        return o @ p['wo'] + p['bo']

    def ln(z, g, b):
        mu = jnp.mean(z, -1, keepdims=True)
        var = jnp.mean((z - mu) ** 2, -1, keepdims=True)
        return (z - mu) * jax.lax.rsqrt(var + 1e-5) * g + b

    a1 = mha(x, x, x, mask)
    n1 = ln(a1, p['g1'], p['be1'])
    a2 = mha(n1, enc, enc, None)
    n2 = ln(a2, p['g2'], p['be2'])
    h1 = jnp.maximum(n2 @ p['w1'] + p['b1'], 0.0)
    return h1 @ p['w2'] + p['b2']


def make_params(key, d_token, d_ff):
    keys = jax.random.split(key, 12)
    s = 0.1
    return {
        'wq': s * jax.random.normal(keys[0], (d_token, d_token), jnp.float32),
        'bq': s * jax.random.normal(keys[1], (1, d_token), jnp.float32),
        'wk': s * jax.random.normal(keys[2], (d_token, d_token), jnp.float32),
        'bk': s * jax.random.normal(keys[3], (1, d_token), jnp.float32),
        'wv': s * jax.random.normal(keys[4], (d_token, d_token), jnp.float32),
        'bv': s * jax.random.normal(keys[5], (1, d_token), jnp.float32),
        'wo': s * jax.random.normal(keys[6], (d_token, d_token), jnp.float32),
        'bo': s * jax.random.normal(keys[7], (1, d_token), jnp.float32),
        'g1': jnp.ones((1, d_token), jnp.float32),
        'be1': jnp.zeros((1, d_token), jnp.float32),
        'g2': jnp.ones((1, d_token), jnp.float32),
        'be2': jnp.zeros((1, d_token), jnp.float32),
        'w1': s * jax.random.normal(keys[8], (d_token, d_ff), jnp.float32),
        'b1': s * jax.random.normal(keys[9], (1, d_ff), jnp.float32),
        'w2': s * jax.random.normal(keys[10], (d_ff, d_token), jnp.float32),
        'b2': s * jax.random.normal(keys[11], (1, d_token), jnp.float32),
    }


if __name__ == "__main__":
    B, S, D = 2, 8, 32
    num_heads, d_ff = 4, 64

    key = jax.random.PRNGKey(0)
    kx, kenc, kp = jax.random.split(key, 3)
    x = jax.random.normal(kx, (B, S, D), jnp.float32)
    enc = jax.random.normal(kenc, (B, S, D), jnp.float32)
    tgt_mask = jnp.tril(jnp.ones((S, S), jnp.int32))   # causal: 1 = attend, 0 = masked

    params = make_params(kp, D, d_ff)
    ref = reference_decoder_layer(x, enc, tgt_mask, params, num_heads)

    # f32 MXU path, in-kernel causal bias: tight semantic check.
    out_f32 = decoder_layer(x, enc, tgt_mask, params, num_heads,
                            compute_dtype=jnp.float32, causal_mask=True)
    out_f32 = jax.block_until_ready(out_f32)
    assert out_f32.shape == (B, S, D)
    assert jnp.allclose(out_f32, ref, atol=2e-2, rtol=2e-2), "f32/causal kernel mismatch"

    # f32 MXU path, DMA'd dense additive mask (arbitrary-mask fallback): same numbers.
    out_dense = decoder_layer(x, enc, tgt_mask, params, num_heads,
                              compute_dtype=jnp.float32, causal_mask=False)
    out_dense = jax.block_until_ready(out_dense)
    assert jnp.allclose(out_dense, ref, atol=2e-2, rtol=2e-2), "f32/dense kernel mismatch"

    # bf16 MXU path with bf16 output (production setting): looser tolerance for bf16
    # rounding at MXU boundaries and the bf16 output store.
    out_bf16 = decoder_layer(x, enc, tgt_mask, params, num_heads,
                             compute_dtype=jnp.bfloat16, causal_mask=True)
    out_bf16 = jax.block_until_ready(out_bf16)
    assert out_bf16.shape == (B, S, D)
    assert jnp.allclose(out_bf16.astype(jnp.float32), ref, atol=1e-1, rtol=1e-1), \
        "bf16 kernel mismatch vs reference"

    print("KERNEL_OK")
</pallas_src>

<mosaic_0001>
module attributes {stable_mosaic.version = 11 : i64} {
  func.func @decoder_layer_kernel(%arg0: i32, %arg1: memref<1x8x32xf32, #tpu.memory_space<vmem>>, %arg2: memref<1x8x32xf32, #tpu.memory_space<vmem>>, %arg3: memref<32x96xf32, #tpu.memory_space<vmem>>, %arg4: memref<1x96xf32, #tpu.memory_space<vmem>>, %arg5: memref<32x32xf32, #tpu.memory_space<vmem>>, %arg6: memref<1x32xf32, #tpu.memory_space<vmem>>, %arg7: memref<1x32xf32, #tpu.memory_space<vmem>>, %arg8: memref<1x32xf32, #tpu.memory_space<vmem>>, %arg9: memref<1x32xf32, #tpu.memory_space<vmem>>, %arg10: memref<1x32xf32, #tpu.memory_space<vmem>>, %arg11: memref<32x64xf32, #tpu.memory_space<vmem>>, %arg12: memref<1x64xf32, #tpu.memory_space<vmem>>, %arg13: memref<64x32xf32, #tpu.memory_space<vmem>>, %arg14: memref<1x32xf32, #tpu.memory_space<vmem>>, %arg15: memref<1x8x32xf32, #tpu.memory_space<vmem>>) attributes {dimension_semantics = [#tpu.dimension_semantics<parallel>], iteration_bounds = array<i64: 2>, scalar_prefetch = 0 : i64, scratch_operands = 0 : i64, tpu.core_type = #tpu.core_type<tc>, window_params = [{transform_indices = @transform_0, window_bounds = array<i64: 1, 8, 32>}, {transform_indices = @transform_1, window_bounds = array<i64: 1, 8, 32>}, {pipeline_mode = #tpu.pipeline_mode<synchronous>, transform_indices = @transform_2, window_bounds = array<i64: 32, 96>}, {pipeline_mode = #tpu.pipeline_mode<synchronous>, transform_indices = @transform_3, window_bounds = array<i64: 1, 96>}, {pipeline_mode = #tpu.pipeline_mode<synchronous>, transform_indices = @transform_4, window_bounds = array<i64: 32, 32>}, {pipeline_mode = #tpu.pipeline_mode<synchronous>, transform_indices = @transform_5, window_bounds = array<i64: 1, 32>}, {pipeline_mode = #tpu.pipeline_mode<synchronous>, transform_indices = @transform_6, window_bounds = array<i64: 1, 32>}, {pipeline_mode = #tpu.pipeline_mode<synchronous>, transform_indices = @transform_7, window_bounds = array<i64: 1, 32>}, {pipeline_mode = #tpu.pipeline_mode<synchronous>, transform_indices = @transform_8, window_bounds = array<i64: 1, 32>}, {pipeline_mode = #tpu.pipeline_mode<synchronous>, transform_indices = @transform_9, window_bounds = array<i64: 1, 32>}, {pipeline_mode = #tpu.pipeline_mode<synchronous>, transform_indices = @transform_10, window_bounds = array<i64: 32, 64>}, {pipeline_mode = #tpu.pipeline_mode<synchronous>, transform_indices = @transform_11, window_bounds = array<i64: 1, 64>}, {pipeline_mode = #tpu.pipeline_mode<synchronous>, transform_indices = @transform_12, window_bounds = array<i64: 64, 32>}, {pipeline_mode = #tpu.pipeline_mode<synchronous>, transform_indices = @transform_13, window_bounds = array<i64: 1, 32>}, {transform_indices = @transform_14, window_bounds = array<i64: 1, 8, 32>}]} {
    %c0 = arith.constant 0 : index
    %c0_0 = arith.constant 0 : index
    %c0_1 = arith.constant 0 : index
    %0 = vector.load %arg1[%c0, %c0_0, %c0_1] : memref<1x8x32xf32, #tpu.memory_space<vmem>>, vector<1x8x32xf32>
    %1 = vector.shape_cast %0 : vector<1x8x32xf32> to vector<8x32xf32>
    %c0_2 = arith.constant 0 : index
    %c0_3 = arith.constant 0 : index
    %c0_4 = arith.constant 0 : index
    %2 = vector.load %arg2[%c0_2, %c0_3, %c0_4] : memref<1x8x32xf32, #tpu.memory_space<vmem>>, vector<1x8x32xf32>
    %3 = vector.shape_cast %2 : vector<1x8x32xf32> to vector<8x32xf32>
    %c0_5 = arith.constant 0 : index
    %c0_6 = arith.constant 0 : index
    %4 = vector.load %arg3[%c0_5, %c0_6] : memref<32x96xf32, #tpu.memory_space<vmem>>, vector<32x96xf32>
    %c0_7 = arith.constant 0 : index
    %c0_8 = arith.constant 0 : index
    %5 = vector.load %arg4[%c0_7, %c0_8] : memref<1x96xf32, #tpu.memory_space<vmem>>, vector<1x96xf32>
    %c0_9 = arith.constant 0 : index
    %c0_10 = arith.constant 0 : index
    %6 = vector.load %arg5[%c0_9, %c0_10] : memref<32x32xf32, #tpu.memory_space<vmem>>, vector<32x32xf32>
    %c0_11 = arith.constant 0 : index
    %c0_12 = arith.constant 0 : index
    %7 = vector.load %arg6[%c0_11, %c0_12] : memref<1x32xf32, #tpu.memory_space<vmem>>, vector<1x32xf32>
    %cst = arith.constant dense<0.000000e+00> : vector<8x96xf32>
    %8 = tpu.matmul %1, %4, %cst {dimension_numbers = #tpu.dot_dimension_numbers<[1], [0], [0], [1], [0, 0, 1, 1], [], []>} : vector<8x32xf32>, vector<32x96xf32>, vector<8x96xf32> -> vector<8x96xf32>
    %9 = vector.broadcast %5 : vector<1x96xf32> to vector<8x96xf32>
    %10 = arith.addf %8, %9 : vector<8x96xf32>
    %11 = vector.extract_strided_slice %10 {offsets = [0, 0], sizes = [8, 32], strides = [1, 1]} : vector<8x96xf32> to vector<8x32xf32>
    %12 = vector.extract_strided_slice %10 {offsets = [0, 32], sizes = [8, 32], strides = [1, 1]} : vector<8x96xf32> to vector<8x32xf32>
    %13 = vector.extract_strided_slice %10 {offsets = [0, 64], sizes = [8, 32], strides = [1, 1]} : vector<8x96xf32> to vector<8x32xf32>
    %14 = vector.shape_cast %11 : vector<8x32xf32> to vector<1x8x4x8xf32>
    %15 = tpu.transpose %14, [0, 2, 1, 3] : vector<1x8x4x8xf32> -> vector<1x4x8x8xf32>
    %16 = vector.shape_cast %15 : vector<1x4x8x8xf32> to vector<4x8x8xf32>
    %17 = vector.shape_cast %12 : vector<8x32xf32> to vector<1x8x4x8xf32>
    %18 = tpu.transpose %17, [0, 2, 1, 3] : vector<1x8x4x8xf32> -> vector<1x4x8x8xf32>
    %19 = vector.shape_cast %18 : vector<1x4x8x8xf32> to vector<4x8x8xf32>
    %20 = vector.shape_cast %13 : vector<8x32xf32> to vector<1x8x4x8xf32>
    %21 = tpu.transpose %20, [0, 2, 1, 3] : vector<1x8x4x8xf32> -> vector<1x4x8x8xf32>
    %22 = vector.shape_cast %21 : vector<1x4x8x8xf32> to vector<4x8x8xf32>
    "tpu.trace_start"() <{level = 10 : i32, message = "nqd,nkd->nqk"}> : () -> ()
    %cst_13 = arith.constant dense<0.000000e+00> : vector<4x8x8xf32>
    %23 = tpu.matmul %16, %19, %cst_13 {dimension_numbers = #tpu.dot_dimension_numbers<[2], [2], [1], [1], [0, 0, 0, 1, 1, 1], [0], [0]>} : vector<4x8x8xf32>, vector<4x8x8xf32>, vector<4x8x8xf32> -> vector<4x8x8xf32>
    "tpu.trace_stop"() : () -> ()
    %cst_14 = arith.constant 0.353553385 : f32
    %24 = vector.broadcast %cst_14 : f32 to vector<4x8x8xf32>
    %25 = arith.mulf %23, %24 : vector<4x8x8xf32>
    %26 = tpu.iota {dimensions = array<i32: 0>} : vector<8x8xi32>
    %27 = tpu.iota {dimensions = array<i32: 1>} : vector<8x8xi32>
    %c0_i32 = arith.constant 0 : i32
    %28 = vector.broadcast %c0_i32 : i32 to vector<8x8xi32>
    %29 = arith.addi %27, %28 : vector<8x8xi32>
    %30 = arith.cmpi sgt, %29, %26 : vector<8x8xi32>
    %cst_15 = arith.constant -1.000000e+09 : f32
    %cst_16 = arith.constant 0.000000e+00 : f32
    %31 = vector.broadcast %cst_15 : f32 to vector<8x8xf32>
    %32 = vector.broadcast %cst_16 : f32 to vector<8x8xf32>
    %33 = arith.select %30, %31, %32 : vector<8x8xi1>, vector<8x8xf32>
    %34 = vector.shape_cast %33 : vector<8x8xf32> to vector<1x8x8xf32>
    %35 = vector.broadcast %34 : vector<1x8x8xf32> to vector<4x8x8xf32>
    %36 = arith.addf %25, %35 : vector<4x8x8xf32>
    %cst_17 = arith.constant dense<0xFF800000> : vector<4x8xf32>
    %37 = vector.multi_reduction <maximumf>, %36, %cst_17 [2] : vector<4x8x8xf32> to vector<4x8xf32>
    %38 = vector.shape_cast %37 : vector<4x8xf32> to vector<4x8x1xf32>
    %39 = vector.broadcast %38 : vector<4x8x1xf32> to vector<4x8x8xf32>
    %40 = arith.subf %36, %39 : vector<4x8x8xf32>
    %41 = math.exp %40 : vector<4x8x8xf32>
    %cst_18 = arith.constant dense<0.000000e+00> : vector<4x8xf32>
    %42 = vector.multi_reduction <add>, %41, %cst_18 [2] : vector<4x8x8xf32> to vector<4x8xf32>
    %43 = vector.shape_cast %42 : vector<4x8xf32> to vector<4x8x1xf32>
    "tpu.trace_start"() <{level = 10 : i32, message = "nqk,nkd->nqd"}> : () -> ()
    %cst_19 = arith.constant dense<0.000000e+00> : vector<4x8x8xf32>
    %44 = tpu.matmul %41, %22, %cst_19 {dimension_numbers = #tpu.dot_dimension_numbers<[2], [1], [1], [2], [0, 0, 0, 1, 1, 2], [0], [0]>} : vector<4x8x8xf32>, vector<4x8x8xf32>, vector<4x8x8xf32> -> vector<4x8x8xf32>
    "tpu.trace_stop"() : () -> ()
    %45 = tpu.reciprocal %43 {approx = true} : vector<4x8x1xf32> -> vector<4x8x1xf32>
    %46 = vector.broadcast %45 : vector<4x8x1xf32> to vector<4x8x8xf32>
    %47 = arith.mulf %44, %46 : vector<4x8x8xf32>
    %48 = vector.shape_cast %47 : vector<4x8x8xf32> to vector<1x4x8x8xf32>
    %49 = tpu.transpose %48, [0, 2, 1, 3] : vector<1x4x8x8xf32> -> vector<1x8x4x8xf32>
    %50 = vector.shape_cast %49 : vector<1x8x4x8xf32> to vector<8x32xf32>
    %cst_20 = arith.constant dense<0.000000e+00> : vector<8x32xf32>
    %51 = tpu.matmul %50, %6, %cst_20 {dimension_numbers = #tpu.dot_dimension_numbers<[1], [0], [0], [1], [0, 0, 1, 1], [], []>} : vector<8x32xf32>, vector<32x32xf32>, vector<8x32xf32> -> vector<8x32xf32>
    %52 = vector.broadcast %7 : vector<1x32xf32> to vector<8x32xf32>
    %53 = arith.addf %51, %52 : vector<8x32xf32>
    %c0_21 = arith.constant 0 : index
    %c0_22 = arith.constant 0 : index
    %54 = vector.load %arg7[%c0_21, %c0_22] : memref<1x32xf32, #tpu.memory_space<vmem>>, vector<1x32xf32>
    %c0_23 = arith.constant 0 : index
    %c0_24 = arith.constant 0 : index
    %55 = vector.load %arg8[%c0_23, %c0_24] : memref<1x32xf32, #tpu.memory_space<vmem>>, vector<1x32xf32>
    %cst_25 = arith.constant dense<0.000000e+00> : vector<8xf32>
    %56 = vector.multi_reduction <add>, %53, %cst_25 [1] : vector<8x32xf32> to vector<8xf32>
    %57 = vector.shape_cast %56 : vector<8xf32> to vector<8x1xf32>
    %cst_26 = arith.constant 3.200000e+01 : f32
    %58 = vector.broadcast %cst_26 : f32 to vector<8x1xf32>
    %59 = arith.divf %57, %58 : vector<8x1xf32>
    %60 = vector.broadcast %59 : vector<8x1xf32> to vector<8x32xf32>
    %61 = arith.subf %53, %60 : vector<8x32xf32>
    %62 = arith.mulf %61, %61 : vector<8x32xf32>
    %cst_27 = arith.constant dense<0.000000e+00> : vector<8xf32>
    %63 = vector.multi_reduction <add>, %62, %cst_27 [1] : vector<8x32xf32> to vector<8xf32>
    %64 = vector.shape_cast %63 : vector<8xf32> to vector<8x1xf32>
    %cst_28 = arith.constant 3.200000e+01 : f32
    %65 = vector.broadcast %cst_28 : f32 to vector<8x1xf32>
    %66 = arith.divf %64, %65 : vector<8x1xf32>
    %67 = vector.broadcast %59 : vector<8x1xf32> to vector<8x32xf32>
    %68 = arith.subf %53, %67 : vector<8x32xf32>
    %cst_29 = arith.constant 9.99999974E-6 : f32
    %69 = vector.broadcast %cst_29 : f32 to vector<8x1xf32>
    %70 = arith.addf %66, %69 : vector<8x1xf32>
    %71 = math.rsqrt %70 : vector<8x1xf32>
    %72 = vector.broadcast %71 : vector<8x1xf32> to vector<8x32xf32>
    %73 = arith.mulf %68, %72 : vector<8x32xf32>
    %74 = vector.broadcast %54 : vector<1x32xf32> to vector<8x32xf32>
    %75 = arith.mulf %73, %74 : vector<8x32xf32>
    %76 = vector.broadcast %55 : vector<1x32xf32> to vector<8x32xf32>
    %77 = arith.addf %75, %76 : vector<8x32xf32>
    %78 = vector.extract_strided_slice %4 {offsets = [0, 0], sizes = [32, 32], strides = [1, 1]} : vector<32x96xf32> to vector<32x32xf32>
    %cst_30 = arith.constant dense<0.000000e+00> : vector<8x32xf32>
    %79 = tpu.matmul %77, %78, %cst_30 {dimension_numbers = #tpu.dot_dimension_numbers<[1], [0], [0], [1], [0, 0, 1, 1], [], []>} : vector<8x32xf32>, vector<32x32xf32>, vector<8x32xf32> -> vector<8x32xf32>
    %80 = vector.extract_strided_slice %5 {offsets = [0, 0], sizes = [1, 32], strides = [1, 1]} : vector<1x96xf32> to vector<1x32xf32>
    %81 = vector.broadcast %80 : vector<1x32xf32> to vector<8x32xf32>
    %82 = arith.addf %79, %81 : vector<8x32xf32>
    %83 = vector.extract_strided_slice %4 {offsets = [0, 32], sizes = [32, 64], strides = [1, 1]} : vector<32x96xf32> to vector<32x64xf32>
    %cst_31 = arith.constant dense<0.000000e+00> : vector<8x64xf32>
    %84 = tpu.matmul %3, %83, %cst_31 {dimension_numbers = #tpu.dot_dimension_numbers<[1], [0], [0], [1], [0, 0, 1, 1], [], []>} : vector<8x32xf32>, vector<32x64xf32>, vector<8x64xf32> -> vector<8x64xf32>
    %85 = vector.extract_strided_slice %5 {offsets = [0, 32], sizes = [1, 64], strides = [1, 1]} : vector<1x96xf32> to vector<1x64xf32>
    %86 = vector.broadcast %85 : vector<1x64xf32> to vector<8x64xf32>
    %87 = arith.addf %84, %86 : vector<8x64xf32>
    %88 = vector.extract_strided_slice %87 {offsets = [0, 0], sizes = [8, 32], strides = [1, 1]} : vector<8x64xf32> to vector<8x32xf32>
    %89 = vector.extract_strided_slice %87 {offsets = [0, 32], sizes = [8, 32], strides = [1, 1]} : vector<8x64xf32> to vector<8x32xf32>
    %90 = vector.shape_cast %82 : vector<8x32xf32> to vector<1x8x4x8xf32>
    %91 = tpu.transpose %90, [0, 2, 1, 3] : vector<1x8x4x8xf32> -> vector<1x4x8x8xf32>
    %92 = vector.shape_cast %91 : vector<1x4x8x8xf32> to vector<4x8x8xf32>
    %93 = vector.shape_cast %88 : vector<8x32xf32> to vector<1x8x4x8xf32>
    %94 = tpu.transpose %93, [0, 2, 1, 3] : vector<1x8x4x8xf32> -> vector<1x4x8x8xf32>
    %95 = vector.shape_cast %94 : vector<1x4x8x8xf32> to vector<4x8x8xf32>
    %96 = vector.shape_cast %89 : vector<8x32xf32> to vector<1x8x4x8xf32>
    %97 = tpu.transpose %96, [0, 2, 1, 3] : vector<1x8x4x8xf32> -> vector<1x4x8x8xf32>
    %98 = vector.shape_cast %97 : vector<1x4x8x8xf32> to vector<4x8x8xf32>
    "tpu.trace_start"() <{level = 10 : i32, message = "nqd,nkd->nqk"}> : () -> ()
    %cst_32 = arith.constant dense<0.000000e+00> : vector<4x8x8xf32>
    %99 = tpu.matmul %92, %95, %cst_32 {dimension_numbers = #tpu.dot_dimension_numbers<[2], [2], [1], [1], [0, 0, 0, 1, 1, 1], [0], [0]>} : vector<4x8x8xf32>, vector<4x8x8xf32>, vector<4x8x8xf32> -> vector<4x8x8xf32>
    "tpu.trace_stop"() : () -> ()
    %cst_33 = arith.constant 0.353553385 : f32
    %100 = vector.broadcast %cst_33 : f32 to vector<4x8x8xf32>
    %101 = arith.mulf %99, %100 : vector<4x8x8xf32>
    %cst_34 = arith.constant dense<0xFF800000> : vector<4x8xf32>
    %102 = vector.multi_reduction <maximumf>, %101, %cst_34 [2] : vector<4x8x8xf32> to vector<4x8xf32>
    %103 = vector.shape_cast %102 : vector<4x8xf32> to vector<4x8x1xf32>
    %104 = vector.broadcast %103 : vector<4x8x1xf32> to vector<4x8x8xf32>
    %105 = arith.subf %101, %104 : vector<4x8x8xf32>
    %106 = math.exp %105 : vector<4x8x8xf32>
    %cst_35 = arith.constant dense<0.000000e+00> : vector<4x8xf32>
    %107 = vector.multi_reduction <add>, %106, %cst_35 [2] : vector<4x8x8xf32> to vector<4x8xf32>
    %108 = vector.shape_cast %107 : vector<4x8xf32> to vector<4x8x1xf32>
    "tpu.trace_start"() <{level = 10 : i32, message = "nqk,nkd->nqd"}> : () -> ()
    %cst_36 = arith.constant dense<0.000000e+00> : vector<4x8x8xf32>
    %109 = tpu.matmul %106, %98, %cst_36 {dimension_numbers = #tpu.dot_dimension_numbers<[2], [1], [1], [2], [0, 0, 0, 1, 1, 2], [0], [0]>} : vector<4x8x8xf32>, vector<4x8x8xf32>, vector<4x8x8xf32> -> vector<4x8x8xf32>
    "tpu.trace_stop"() : () -> ()
    %110 = tpu.reciprocal %108 {approx = true} : vector<4x8x1xf32> -> vector<4x8x1xf32>
    %111 = vector.broadcast %110 : vector<4x8x1xf32> to vector<4x8x8xf32>
    %112 = arith.mulf %109, %111 : vector<4x8x8xf32>
    %113 = vector.shape_cast %112 : vector<4x8x8xf32> to vector<1x4x8x8xf32>
    %114 = tpu.transpose %113, [0, 2, 1, 3] : vector<1x4x8x8xf32> -> vector<1x8x4x8xf32>
    %115 = vector.shape_cast %114 : vector<1x8x4x8xf32> to vector<8x32xf32>
    %cst_37 = arith.constant dense<0.000000e+00> : vector<8x32xf32>
    %116 = tpu.matmul %115, %6, %cst_37 {dimension_numbers = #tpu.dot_dimension_numbers<[1], [0], [0], [1], [0, 0, 1, 1], [], []>} : vector<8x32xf32>, vector<32x32xf32>, vector<8x32xf32> -> vector<8x32xf32>
    %117 = vector.broadcast %7 : vector<1x32xf32> to vector<8x32xf32>
    %118 = arith.addf %116, %117 : vector<8x32xf32>
    %c0_38 = arith.constant 0 : index
    %c0_39 = arith.constant 0 : index
    %119 = vector.load %arg9[%c0_38, %c0_39] : memref<1x32xf32, #tpu.memory_space<vmem>>, vector<1x32xf32>
    %c0_40 = arith.constant 0 : index
    %c0_41 = arith.constant 0 : index
    %120 = vector.load %arg10[%c0_40, %c0_41] : memref<1x32xf32, #tpu.memory_space<vmem>>, vector<1x32xf32>
    %cst_42 = arith.constant dense<0.000000e+00> : vector<8xf32>
    %121 = vector.multi_reduction <add>, %118, %cst_42 [1] : vector<8x32xf32> to vector<8xf32>
    %122 = vector.shape_cast %121 : vector<8xf32> to vector<8x1xf32>
    %cst_43 = arith.constant 3.200000e+01 : f32
    %123 = vector.broadcast %cst_43 : f32 to vector<8x1xf32>
    %124 = arith.divf %122, %123 : vector<8x1xf32>
    %125 = vector.broadcast %124 : vector<8x1xf32> to vector<8x32xf32>
    %126 = arith.subf %118, %125 : vector<8x32xf32>
    %127 = arith.mulf %126, %126 : vector<8x32xf32>
    %cst_44 = arith.constant dense<0.000000e+00> : vector<8xf32>
    %128 = vector.multi_reduction <add>, %127, %cst_44 [1] : vector<8x32xf32> to vector<8xf32>
    %129 = vector.shape_cast %128 : vector<8xf32> to vector<8x1xf32>
    %cst_45 = arith.constant 3.200000e+01 : f32
    %130 = vector.broadcast %cst_45 : f32 to vector<8x1xf32>
    %131 = arith.divf %129, %130 : vector<8x1xf32>
    %132 = vector.broadcast %124 : vector<8x1xf32> to vector<8x32xf32>
    %133 = arith.subf %118, %132 : vector<8x32xf32>
    %cst_46 = arith.constant 9.99999974E-6 : f32
    %134 = vector.broadcast %cst_46 : f32 to vector<8x1xf32>
    %135 = arith.addf %131, %134 : vector<8x1xf32>
    %136 = math.rsqrt %135 : vector<8x1xf32>
    %137 = vector.broadcast %136 : vector<8x1xf32> to vector<8x32xf32>
    %138 = arith.mulf %133, %137 : vector<8x32xf32>
    %139 = vector.broadcast %119 : vector<1x32xf32> to vector<8x32xf32>
    %140 = arith.mulf %138, %139 : vector<8x32xf32>
    %141 = vector.broadcast %120 : vector<1x32xf32> to vector<8x32xf32>
    %142 = arith.addf %140, %141 : vector<8x32xf32>
    %c0_47 = arith.constant 0 : index
    %c0_48 = arith.constant 0 : index
    %143 = vector.load %arg11[%c0_47, %c0_48] : memref<32x64xf32, #tpu.memory_space<vmem>>, vector<32x64xf32>
    %cst_49 = arith.constant dense<0.000000e+00> : vector<8x64xf32>
    %144 = tpu.matmul %142, %143, %cst_49 {dimension_numbers = #tpu.dot_dimension_numbers<[1], [0], [0], [1], [0, 0, 1, 1], [], []>} : vector<8x32xf32>, vector<32x64xf32>, vector<8x64xf32> -> vector<8x64xf32>
    %c0_50 = arith.constant 0 : index
    %c0_51 = arith.constant 0 : index
    %145 = vector.load %arg12[%c0_50, %c0_51] : memref<1x64xf32, #tpu.memory_space<vmem>>, vector<1x64xf32>
    %146 = vector.broadcast %145 : vector<1x64xf32> to vector<8x64xf32>
    %147 = arith.addf %144, %146 : vector<8x64xf32>
    %cst_52 = arith.constant 0.000000e+00 : f32
    %148 = vector.broadcast %cst_52 : f32 to vector<8x64xf32>
    %149 = arith.maximumf %147, %148 : vector<8x64xf32>
    %c0_53 = arith.constant 0 : index
    %c0_54 = arith.constant 0 : index
    %150 = vector.load %arg13[%c0_53, %c0_54] : memref<64x32xf32, #tpu.memory_space<vmem>>, vector<64x32xf32>
    %cst_55 = arith.constant dense<0.000000e+00> : vector<8x32xf32>
    %151 = tpu.matmul %149, %150, %cst_55 {dimension_numbers = #tpu.dot_dimension_numbers<[1], [0], [0], [1], [0, 0, 1, 1], [], []>} : vector<8x64xf32>, vector<64x32xf32>, vector<8x32xf32> -> vector<8x32xf32>
    %c0_56 = arith.constant 0 : index
    %c0_57 = arith.constant 0 : index
    %152 = vector.load %arg14[%c0_56, %c0_57] : memref<1x32xf32, #tpu.memory_space<vmem>>, vector<1x32xf32>
    %153 = vector.broadcast %152 : vector<1x32xf32> to vector<8x32xf32>
    %154 = arith.addf %151, %153 : vector<8x32xf32>
    %155 = vector.shape_cast %154 : vector<8x32xf32> to vector<1x8x32xf32>
    %c0_58 = arith.constant 0 : index
    %c0_59 = arith.constant 0 : index
    %c0_60 = arith.constant 0 : index
    %156 = vector.load %arg15[%c0_58, %c0_59, %c0_60] : memref<1x8x32xf32, #tpu.memory_space<vmem>>, vector<1x8x32xf32>
    tpu.vector_store %arg15[%c0_58, %c0_59, %c0_60], %155 {strides = array<i32>} : memref<1x8x32xf32, #tpu.memory_space<vmem>>, vector<1x8x32xf32>,
    return
  }
  func.func @transform_0(%arg0: i32) -> (i32, i32, i32) {
    %c0_i32 = arith.constant 0 : i32
    %c0_i32_0 = arith.constant 0 : i32
    %c0_i32_1 = arith.constant 0 : i32
    return %arg0, %c0_i32, %c0_i32_0 : i32, i32, i32
  }
  func.func @transform_1(%arg0: i32) -> (i32, i32, i32) {
    %c0_i32 = arith.constant 0 : i32
    %c0_i32_0 = arith.constant 0 : i32
    %c0_i32_1 = arith.constant 0 : i32
    return %arg0, %c0_i32, %c0_i32_0 : i32, i32, i32
  }
  func.func @transform_2(%arg0: i32) -> (i32, i32) {
    %c0_i32 = arith.constant 0 : i32
    %c0_i32_0 = arith.constant 0 : i32
    %c0_i32_1 = arith.constant 0 : i32
    return %c0_i32, %c0_i32_0 : i32, i32
  }
  func.func @transform_3(%arg0: i32) -> (i32, i32) {
    %c0_i32 = arith.constant 0 : i32
    %c0_i32_0 = arith.constant 0 : i32
    %c0_i32_1 = arith.constant 0 : i32
    return %c0_i32, %c0_i32_0 : i32, i32
  }
  func.func @transform_4(%arg0: i32) -> (i32, i32) {
    %c0_i32 = arith.constant 0 : i32
    %c0_i32_0 = arith.constant 0 : i32
    %c0_i32_1 = arith.constant 0 : i32
    return %c0_i32, %c0_i32_0 : i32, i32
  }
  func.func @transform_5(%arg0: i32) -> (i32, i32) {
    %c0_i32 = arith.constant 0 : i32
    %c0_i32_0 = arith.constant 0 : i32
    %c0_i32_1 = arith.constant 0 : i32
    return %c0_i32, %c0_i32_0 : i32, i32
  }
  func.func @transform_6(%arg0: i32) -> (i32, i32) {
    %c0_i32 = arith.constant 0 : i32
    %c0_i32_0 = arith.constant 0 : i32
    %c0_i32_1 = arith.constant 0 : i32
    return %c0_i32, %c0_i32_0 : i32, i32
  }
  func.func @transform_7(%arg0: i32) -> (i32, i32) {
    %c0_i32 = arith.constant 0 : i32
    %c0_i32_0 = arith.constant 0 : i32
    %c0_i32_1 = arith.constant 0 : i32
    return %c0_i32, %c0_i32_0 : i32, i32
  }
  func.func @transform_8(%arg0: i32) -> (i32, i32) {
    %c0_i32 = arith.constant 0 : i32
    %c0_i32_0 = arith.constant 0 : i32
    %c0_i32_1 = arith.constant 0 : i32
    return %c0_i32, %c0_i32_0 : i32, i32
  }
  func.func @transform_9(%arg0: i32) -> (i32, i32) {
    %c0_i32 = arith.constant 0 : i32
    %c0_i32_0 = arith.constant 0 : i32
    %c0_i32_1 = arith.constant 0 : i32
    return %c0_i32, %c0_i32_0 : i32, i32
  }
  func.func @transform_10(%arg0: i32) -> (i32, i32) {
    %c0_i32 = arith.constant 0 : i32
    %c0_i32_0 = arith.constant 0 : i32
    %c0_i32_1 = arith.constant 0 : i32
    return %c0_i32, %c0_i32_0 : i32, i32
  }
  func.func @transform_11(%arg0: i32) -> (i32, i32) {
    %c0_i32 = arith.constant 0 : i32
    %c0_i32_0 = arith.constant 0 : i32
    %c0_i32_1 = arith.constant 0 : i32
    return %c0_i32, %c0_i32_0 : i32, i32
  }
  func.func @transform_12(%arg0: i32) -> (i32, i32) {
    %c0_i32 = arith.constant 0 : i32
    %c0_i32_0 = arith.constant 0 : i32
    %c0_i32_1 = arith.constant 0 : i32
    return %c0_i32, %c0_i32_0 : i32, i32
  }
  func.func @transform_13(%arg0: i32) -> (i32, i32) {
    %c0_i32 = arith.constant 0 : i32
    %c0_i32_0 = arith.constant 0 : i32
    %c0_i32_1 = arith.constant 0 : i32
    return %c0_i32, %c0_i32_0 : i32, i32
  }
  func.func @transform_14(%arg0: i32) -> (i32, i32, i32) {
    %c0_i32 = arith.constant 0 : i32
    %c0_i32_0 = arith.constant 0 : i32
    %c0_i32_1 = arith.constant 0 : i32
    return %arg0, %c0_i32, %c0_i32_0 : i32, i32, i32
  }
}

</mosaic_0001>

<bundles_post_ra>
// kernel: tpu_custom_call.1
= control target key start
LH: loop header
LB: loop body
LE: loop exit
PB: predicated region body
PF: predicated region fallthrough
CT: control target
= control target key end

     0   :  { %s6113_s0 = inlined_call_operand.hbm [shape: f32[2,8,32], index: 0, kind: input, shape index: {}]   ;;  %s6114_s1 = inlined_call_operand.hbm [shape: f32[2,8,32], index: 1, kind: input, shape index: {}]   ;;  %s6115_s2 = inlined_call_operand.hbm [shape: f32[32,96], index: 2, kind: input, shape index: {}]   ;;  %s6116_s3 = inlined_call_operand.hbm [shape: f32[1,96], index: 3, kind: input, shape index: {}]   ;;  %s6117_s4 = inlined_call_operand.hbm [shape: f32[32,32], index: 4, kind: input, shape index: {}]   ;;  %s6118_s5 = inlined_call_operand.hbm [shape: f32[1,32], index: 5, kind: input, shape index: {}]   ;;  %s6119_s6 = inlined_call_operand.hbm [shape: f32[1,32], index: 6, kind: input, shape index: {}]   ;;  %s6120_s7 = inlined_call_operand.hbm [shape: f32[1,32], index: 7, kind: input, shape index: {}]   ;;  %s6121_s8 = inlined_call_operand.hbm [shape: f32[1,32], index: 8, kind: input, shape index: {}]   ;;  %s6122_s9 = inlined_call_operand.hbm [shape: f32[1,32], index: 9, kind: input, shape index: {}]   ;;  %s6123_s10 = inlined_call_operand.hbm [shape: f32[32,64], index: 10, kind: input, shape index: {}]   ;;  %s6124_s11 = inlined_call_operand.hbm [shape: f32[1,64], index: 11, kind: input, shape index: {}]   ;;  %s6125_s12 = inlined_call_operand.hbm [shape: f32[64,32], index: 12, kind: input, shape index: {}]   ;;  %s6126_s13 = inlined_call_operand.hbm [shape: f32[1,32], index: 13, kind: input, shape index: {}]   ;;  %s6127_s14 = inlined_call_operand.hbm [shape: f32[2,8,32], index: 14, kind: output, shape index: {}]  }
   0x1   :  { %6141 = sst [smem:[#allocation39_spill]] %s6113_s0 }
   0x2   :  { %6142 = sst [smem:[#allocation40_spill]] %s6114_s1 }
   0x3   :  { %6143 = sst [smem:[#allocation41_spill]] %s6115_s2 }
   0x4   :  { %6144 = sst [smem:[#allocation42_spill]] %s6116_s3 }
   0x5   :  { %6145 = sst [smem:[#allocation43_spill]] %s6117_s4 }
   0x6   :  { %6146 = sst [smem:[#allocation44_spill]] %s6118_s5 }
   0x7   :  { %6147 = sst [smem:[#allocation45_spill]] %s6119_s6 }
   0x8   :  { %6148 = sst [smem:[#allocation46_spill]] %s6120_s7 }
   0x9   :  { %6149 = sst [smem:[#allocation47_spill]] %s6121_s8 }
   0xa   :  { %6150 = sst [smem:[#allocation48_spill]] %s6127_s14 }
   0xb   :  { %19 = vsyncpa [#allocation3], 0 }
   0xc   :  { %21 = vsyncpa [#allocation3 + $0x1], 0 }
   0xd   :  { %22 = vsyncpa [#allocation6], 0 }
   0xe   :  { %24 = vsyncpa [#allocation6 + $0x1], 0 }
   0xf   :  { %25 = vsyncpa [#allocation9], 0 }
  0x10   :  { %26 = vsyncpa [#allocation12], 0 }
  0x11   :  { %27 = vsyncpa [#allocation15], 0 }
  0x12   :  { %28 = vsyncpa [#allocation18], 0 }
  0x13   :  { %29 = vsyncpa [#allocation21], 0 }
  0x14   :  { %30 = vsyncpa [#allocation24], 0 }
  0x15   :  { %31 = vsyncpa [#allocation4], 0 }
  0x16   :  { %33 = vsyncpa [#allocation4 + $0x1], 0  ;;  %s5239_s29 = smov 0   ;;  %s5241_s30 = smov 0  }
  0x17   :  { %s5243_s15 = smov 0   ;;  %s5245_s16 = smov 0  }
  0x18 LB: > { %6151 = sst [smem:[#allocation36_spill]] %s5120_s29  ;;  %s5134_s17 = smov [#allocation7]   ;;  %s5132_s16 = sphi %s5245_s16, %s6202_s16   ;;  %s5128_s15 = sphi %s5243_s15, %s6201_s15   ;;  %s5124_s30 = sphi %s5241_s30, %s6200_s30   ;;  %s5120_s29 = sphi %s5239_s29, %s6199_s29  }
  0x19   : > { %s386_s18 = sshll.u32 %s5134_s17, 4  ;;  %s5260_s19 = sadd.s32 4294967295, %s5132_s16   ;;  %s5265_s18 = int_to_ptr.vmem [resolvable:$true] %s386_s18 }
  0x1a   : > { %6152 = sst [smem:[#allocation37_spill]] %s5260_s19  ;;  %p4028_p0 = scmp.ge.s32.totalorder %s5132_s16, 1 }
  0x1b   : > { %p6137_p1 = scmp.eq.s32.totalorder %s5260_s19, 0  ;;  %p374_p2 = scmp.lt.s32.totalorder %s5132_s16, 3 }
  0x1c   : > { %s5135_s21 = smov [#allocation8]   ;;  %s5136_s24 = smov [#allocation11]  }
  0x1d   : > { %p5267_p3 = pnand %p4028_p0, %p374_p2  ;;  %s400_s22 = sshll.u32 %s5135_s21, 4  ;;  %s5280_s22 = int_to_ptr.vmem [resolvable:$true] %s400_s22 }
  0x1e   : > { %s424_s25 = sshll.u32 %s5136_s24, 4  ;;  %s6156_s2 = sld [smem:[#allocation41_spill]]  ;;  %s5282_s25 = int_to_ptr.vmem [resolvable:$true] %s424_s25 }
  0x1f   : > { %s6153_s20 = scalar_select %p5267_p3, 1, 0 }
  0x20   : > { %p4459_p5 = pneg %p5267_p3 }
  0x21   : > { %6154 = sst [smem:[#allocation38_spill]] %s6153_s20 }
  0x22   : > { %p5276_p6 = pnand %p4459_p5, %p6137_p1 }
  0x24   : > { %s4638_s28 = scalar_lea.hbm %s6156_s2, 512  ;;  %p5292_p8 = pneg %p5276_p6 }
  0x25   : > { %p4639_p7 = scmp.ne.s32.totalorder %s6156_s2, %s4638_s28  ;;  %p4645_p11 = scmp.lt.u32.totalorder %s4638_s28, %s6156_s2 }
  0x27   : > { %p4641_p9 = pnand %p5292_p8, %p4639_p7 }
  0x29   : > { %p4642_p10 = pneg %p4641_p9 }
  0x2b   : > { %p4647_p12 = pnand %p4645_p11, %p4642_p10 }
  0x2d   : > { %4650 = shalt.err (!%p4647_p12)
}
  0x2e   : > { %s4651_s14 = scalar_lea.vmem %s5265_s18, 512  ;;  %p4659_p5 = scmp.lt.s32.totalorder %s5265_s18, %s5265_s18 }
  0x2f   : > { %p4652_p13 = scmp.ne.s32.totalorder %s5265_s18, %s4651_s14  ;;  %p4660_p4 = scmp.lt.s32.totalorder %s4651_s14, %s4651_s14 }
  0x31   : > { %p4654_p0 = pnand %p4652_p13, %p5292_p8  ;;  %p4661_p7 = por %p4660_p4, %p4659_p5 }
  0x33   : > { %p4655_p2 = pneg %p4654_p0 }
  0x35   : > { %p4662_p9 = pnand %p4661_p7, %p4655_p2 }
  0x37   : > { %4665 = shalt.err (!%p4662_p9)
}
  0x38   : > { %s6135_s26 = smov 128   ;;  %s5138_s20 = smov 8  }
  0x39   : > { %4462 = dma.hbm_to_vmem [thread:$0]  (!%p5276_p6), %s6156_s2, 512, %s5265_s18, [#allocation6], %s6135_s26, %s6135_s26, %s5138_s20  }
  0x3a   : > { %s6158_s3 = sld [smem:[#allocation42_spill]] }
  0x40   : > { %s4666_s14 = scalar_lea.hbm %s6158_s3, 16 }
  0x41   : > { %p4667_p4 = scmp.ne.s32.totalorder %s6158_s3, %s4666_s14  ;;  %p4673_p12 = scmp.lt.u32.totalorder %s4666_s14, %s6158_s3 }
  0x43   : > { %p4669_p10 = pnand %p4667_p4, %p5292_p8 }
  0x45   : > { %p4670_p11 = pneg %p4669_p10 }
  0x47   : > { %p4675_p13 = pnand %p4673_p12, %p4670_p11 }
  0x49   : > { %4678 = shalt.err (!%p4675_p13)
}
  0x4a   : > { %s4679_s18 = scalar_lea.vmem %s5280_s22, 16  ;;  %s4686_s0 = scalar_lea.vmem %s5280_s22, 32 }
  0x4b   : > { %p4680_p0 = scmp.ne.s32.totalorder %s5280_s22, %s4679_s18  ;;  %p4687_p7 = scmp.lt.s32.totalorder %s5280_s22, %s5280_s22 }
  0x4c   : > { %p4688_p9 = scmp.lt.s32.totalorder %s4686_s0, %s4679_s18 }
  0x4d   : > { %p4682_p2 = pnand %p4680_p0, %p5292_p8 }
  0x4e   : > { %p4689_p4 = por %p4688_p9, %p4687_p7 }
  0x4f   : > { %p4683_p5 = pneg %p4682_p2 }
  0x51   : > { %p4690_p10 = pnand %p4689_p4, %p4683_p5 }
  0x53   : > { %4693 = shalt.err (!%p4690_p10)
}
  0x54   : > { %4465 = dma.hbm_to_vmem [thread:$0]  (!%p5276_p6), %s6158_s3, 16, %s5280_s22, [#allocation9]  }
  0x55   : > { %s6159_s5 = sld [smem:[#allocation44_spill]] }
  0x5b   : > { %s4694_s28 = scalar_lea.hbm %s6159_s5, 16 }
  0x5c   : > { %p4695_p11 = scmp.ne.s32.totalorder %s6159_s5, %s4694_s28  ;;  %p4701_p0 = scmp.lt.u32.totalorder %s4694_s28, %s6159_s5 }
  0x5e   : > { %p4697_p12 = pnand %p4695_p11, %p5292_p8 }
  0x60   : > { %p4698_p13 = pneg %p4697_p12 }
  0x62   : > { %p4703_p2 = pnand %p4701_p0, %p4698_p13 }
  0x64   : > { %4706 = shalt.err (!%p4703_p2)
}
  0x65   : > { %s4707_s22 = scalar_lea.vmem %s5282_s25, 16  ;;  %s4714_s0 = scalar_lea.vmem %s5282_s25, 32 }
  0x66   : > { %p4708_p5 = scmp.ne.s32.totalorder %s5282_s25, %s4707_s22  ;;  %p4715_p4 = scmp.lt.s32.totalorder %s5282_s25, %s5282_s25 }
  0x67   : > { %p4716_p10 = scmp.lt.s32.totalorder %s4714_s0, %s4707_s22 }
  0x68   : > { %p4710_p7 = pnand %p4708_p5, %p5292_p8 }
  0x69   : > { %p4717_p11 = por %p4716_p10, %p4715_p4 }
  0x6a   : > { %p4711_p9 = pneg %p4710_p7 }
  0x6c   : > { %p4718_p12 = pnand %p4717_p11, %p4711_p9 }
  0x6e   : > { %4721 = shalt.err (!%p4718_p12)
}
  0x6f   : > { %4471 = dma.hbm_to_vmem [thread:$0]  (!%p5276_p6), %s6159_s5, 16, %s5282_s25, [#allocation12]  }
  0x70   : > { %s5139_s19 = smov [#allocation14]   ;;  %s5140_s28 = smov [#allocation17]  }
  0x71   : > { %s446_s27 = sshll.u32 %s5139_s19, 4  ;;  %s468_s17 = sshll.u32 %s5140_s28, 4  ;;  %s447_s27 = int_to_ptr.vmem [resolvable:$true] %s446_s27  ;;  %s469_s17 = int_to_ptr.vmem [resolvable:$true] %s468_s17 }
  0x72   : > { %s6160_s7 = sld [smem:[#allocation46_spill]] }
  0x78   : > { %s4722_s18 = scalar_lea.hbm %s6160_s7, 16 }
  0x79   : > { %p4723_p13 = scmp.ne.s32.totalorder %s6160_s7, %s4722_s18  ;;  %p4729_p5 = scmp.lt.u32.totalorder %s4722_s18, %s6160_s7 }
  0x7b   : > { %p4725_p0 = pnand %p4723_p13, %p5292_p8 }
  0x7d   : > { %p4726_p2 = pneg %p4725_p0 }
  0x7f   : > { %p4731_p7 = pnand %p4729_p5, %p4726_p2 }
  0x81   : > { %4734 = shalt.err (!%p4731_p7)
}
  0x82   : > { %s4735_s25 = scalar_lea.vmem %s447_s27, 16  ;;  %s4742_s29 = scalar_lea.vmem %s447_s27, 32 }
  0x83   : > { %p4736_p9 = scmp.ne.s32.totalorder %s447_s27, %s4735_s25  ;;  %p4743_p11 = scmp.lt.s32.totalorder %s447_s27, %s447_s27 }
  0x84   : > { %p4744_p12 = scmp.lt.s32.totalorder %s4742_s29, %s4735_s25 }
  0x85   : > { %p4738_p4 = pnand %p4736_p9, %p5292_p8 }
  0x86   : > { %p4745_p1 = por %p4744_p12, %p4743_p11 }
  0x87   : > { %p4739_p10 = pneg %p4738_p4 }
  0x89   : > { %p4746_p3 = pnand %p4745_p1, %p4739_p10 }
  0x8b   : > { %4749 = shalt.err (!%p4746_p3)
}
  0x8c   : > { %4477 = dma.hbm_to_vmem [thread:$0]  (!%p5276_p6), %s6160_s7, 16, %s447_s27, [#allocation15]  }
  0x8d   : > { %s4750_s14 = scalar_lea.hbm %s6122_s9, 16 }
  0x8e   : > { %p4751_p13 = scmp.ne.s32.totalorder %s6122_s9, %s4750_s14  ;;  %p4757_p3 = scmp.lt.u32.totalorder %s4750_s14, %s6122_s9 }
  0x90   : > { %p4753_p0 = pnand %p4751_p13, %p5292_p8 }
  0x92   : > { %p4754_p1 = pneg %p4753_p0 }
  0x94   : > { %p4759_p2 = pnand %p4757_p3, %p4754_p1 }
  0x96   : > { %4762 = shalt.err (!%p4759_p2)
}
  0x97   : > { %s4763_s25 = scalar_lea.vmem %s469_s17, 16  ;;  %s4770_s27 = scalar_lea.vmem %s469_s17, 32 }
  0x98   : > { %p4764_p5 = scmp.ne.s32.totalorder %s469_s17, %s4763_s25  ;;  %p4771_p4 = scmp.lt.s32.totalorder %s469_s17, %s469_s17 }
  0x99   : > { %p4772_p10 = scmp.lt.s32.totalorder %s4770_s27, %s4763_s25 }
  0x9a   : > { %p4766_p7 = pnand %p4764_p5, %p5292_p8 }
  0x9b   : > { %p4773_p11 = por %p4772_p10, %p4771_p4 }
  0x9c   : > { %p4767_p9 = pneg %p4766_p7 }
  0x9e   : > { %p4774_p12 = pnand %p4773_p11, %p4767_p9 }
  0xa0   : > { %4777 = shalt.err (!%p4774_p12)
}
  0xa1   : > { %4483 = dma.hbm_to_vmem [thread:$0]  (!%p5276_p6), %s6122_s9, 16, %s469_s17, [#allocation18]  }
  0xa2   : > { %s5141_s28 = smov [#allocation20]   ;;  %s5142_s24 = smov [#allocation10]  }
  0xa3   : > { %s492_s26 = sshll.u32 %s5141_s28, 4  ;;  %s410_s14 = sshll.u32 %s5142_s24, 4  ;;  %s493_s26 = int_to_ptr.vmem [resolvable:$true] %s492_s26  ;;  %s411_s14 = int_to_ptr.vmem [resolvable:$true] %s410_s14 }
  0xa4   : > { %s4778_s0 = scalar_lea.hbm %s6124_s11, 16 }
  0xa5   : > { %p4779_p13 = scmp.ne.s32.totalorder %s6124_s11, %s4778_s0  ;;  %p4785_p3 = scmp.lt.u32.totalorder %s4778_s0, %s6124_s11 }
  0xa7   : > { %p4781_p0 = pnand %p4779_p13, %p5292_p8 }
  0xa9   : > { %p4782_p1 = pneg %p4781_p0 }
  0xab   : > { %p4787_p2 = pnand %p4785_p3, %p4782_p1 }
  0xad   : > { %4790 = shalt.err (!%p4787_p2)
}
  0xae   : > { %s4791_s17 = scalar_lea.vmem %s493_s26, 16  ;;  %s4798_s19 = scalar_lea.vmem %s493_s26, 32 }
  0xaf   : > { %p4792_p5 = scmp.ne.s32.totalorder %s493_s26, %s4791_s17  ;;  %p4799_p4 = scmp.lt.s32.totalorder %s493_s26, %s493_s26 }
  0xb0   : > { %p4800_p10 = scmp.lt.s32.totalorder %s4798_s19, %s4791_s17 }
  0xb1   : > { %p4794_p7 = pnand %p4792_p5, %p5292_p8 }
  0xb2   : > { %p4801_p11 = por %p4800_p10, %p4799_p4 }
  0xb3   : > { %p4795_p9 = pneg %p4794_p7 }
  0xb5   : > { %p4802_p12 = pnand %p4801_p11, %p4795_p9 }
  0xb7   : > { %4805 = shalt.err (!%p4802_p12)
}
  0xb8   : > { %4489 = dma.hbm_to_vmem [thread:$0]  (!%p5276_p6), %s6124_s11, 16, %s493_s26, [#allocation21]  }
  0xb9   : > { %s6161_s4 = sld [smem:[#allocation43_spill]] }
  0xbf   : > { %s4806_s0 = scalar_lea.hbm %s6161_s4, 512 }
  0xc0   : > { %p4807_p13 = scmp.ne.s32.totalorder %s6161_s4, %s4806_s0  ;;  %p4813_p3 = scmp.lt.u32.totalorder %s4806_s0, %s6161_s4 }
  0xc2   : > { %p4809_p0 = pnand %p4807_p13, %p5292_p8 }
  0xc4   : > { %p4810_p1 = pneg %p4809_p0 }
  0xc6   : > { %p4815_p2 = pnand %p4813_p3, %p4810_p1 }
  0xc8   : > { %4818 = shalt.err (!%p4815_p2)
}
  0xc9   : > { %s4819_s17 = scalar_lea.vmem %s411_s14, 512  ;;  %p4827_p4 = scmp.lt.s32.totalorder %s411_s14, %s411_s14 }
  0xca   : > { %p4820_p5 = scmp.ne.s32.totalorder %s411_s14, %s4819_s17  ;;  %p4828_p10 = scmp.lt.s32.totalorder %s4819_s17, %s4819_s17 }
  0xcc   : > { %p4822_p7 = pnand %p4820_p5, %p5292_p8  ;;  %p4829_p11 = por %p4828_p10, %p4827_p4 }
  0xce   : > { %p4823_p9 = pneg %p4822_p7 }
  0xd0   : > { %p4830_p12 = pnand %p4829_p11, %p4823_p9 }
  0xd2   : > { %4833 = shalt.err (!%p4830_p12)
}
  0xd3   : > { %s6162_s26 = smov 128   ;;  %s5143_s24 = smov [#allocation13]  }
  0xd4   : > { %4468 = dma.hbm_to_vmem [thread:$0]  (!%p5276_p6), %s6161_s4, 512, %s411_s14, [#allocation9], %s6162_s26, %s6162_s26, %s5138_s20  }
  0xd5   : > { %s435_s18 = sshll.u32 %s5143_s24, 4  ;;  %s5144_s22 = smov [#allocation16]   ;;  %s436_s18 = int_to_ptr.vmem [resolvable:$true] %s435_s18 }
  0xd6   : > { %s457_s0 = sshll.u32 %s5144_s22, 4  ;;  %s6163_s6 = sld [smem:[#allocation45_spill]]  ;;  %s458_s0 = int_to_ptr.vmem [resolvable:$true] %s457_s0 }
  0xdc   : > { %s4834_s27 = scalar_lea.hbm %s6163_s6, 16 }
  0xdd   : > { %p4835_p13 = scmp.ne.s32.totalorder %s6163_s6, %s4834_s27  ;;  %p4841_p3 = scmp.lt.u32.totalorder %s4834_s27, %s6163_s6 }
  0xdf   : > { %p4837_p0 = pnand %p4835_p13, %p5292_p8 }
  0xe1   : > { %p4838_p1 = pneg %p4837_p0 }
  0xe3   : > { %p4843_p2 = pnand %p4841_p3, %p4838_p1 }
  0xe5   : > { %4846 = shalt.err (!%p4843_p2)
}
  0xe6   : > { %s4847_s14 = scalar_lea.vmem %s436_s18, 16  ;;  %s4854_s28 = scalar_lea.vmem %s436_s18, 32 }
  0xe7   : > { %p4848_p5 = scmp.ne.s32.totalorder %s436_s18, %s4847_s14  ;;  %p4855_p4 = scmp.lt.s32.totalorder %s436_s18, %s436_s18 }
  0xe8   : > { %p4856_p10 = scmp.lt.s32.totalorder %s4854_s28, %s4847_s14 }
  0xe9   : > { %p4850_p7 = pnand %p4848_p5, %p5292_p8 }
  0xea   : > { %p4857_p11 = por %p4856_p10, %p4855_p4 }
  0xeb   : > { %p4851_p9 = pneg %p4850_p7 }
  0xed   : > { %p4858_p12 = pnand %p4857_p11, %p4851_p9 }
  0xef   : > { %4861 = shalt.err (!%p4858_p12)
}
  0xf0   : > { %4474 = dma.hbm_to_vmem [thread:$0]  (!%p5276_p6), %s6163_s6, 16, %s436_s18, [#allocation12]  }
  0xf1   : > { %s6164_s8 = sld [smem:[#allocation47_spill]] }
  0xf7   : > { %s4862_s25 = scalar_lea.hbm %s6164_s8, 16 }
  0xf8   : > { %p4863_p13 = scmp.ne.s32.totalorder %s6164_s8, %s4862_s25  ;;  %p4869_p3 = scmp.lt.u32.totalorder %s4862_s25, %s6164_s8 }
  0xfa   : > { %p4865_p0 = pnand %p4863_p13, %p5292_p8 }
  0xfc   : > { %p4866_p1 = pneg %p4865_p0 }
  0xfe   : > { %p4871_p2 = pnand %p4869_p3, %p4866_p1 }
 0x100   : > { %4874 = shalt.err (!%p4871_p2)
}
 0x101   : > { %s4875_s14 = scalar_lea.vmem %s458_s0, 16  ;;  %s4882_s18 = scalar_lea.vmem %s458_s0, 32 }
 0x102   : > { %p4876_p5 = scmp.ne.s32.totalorder %s458_s0, %s4875_s14  ;;  %p4883_p4 = scmp.lt.s32.totalorder %s458_s0, %s458_s0 }
 0x103   : > { %p4884_p10 = scmp.lt.s32.totalorder %s4882_s18, %s4875_s14 }
 0x104   : > { %p4878_p7 = pnand %p4876_p5, %p5292_p8 }
 0x105   : > { %p4885_p11 = por %p4884_p10, %p4883_p4 }
 0x106   : > { %p4879_p9 = pneg %p4878_p7 }
 0x108   : > { %p4886_p12 = pnand %p4885_p11, %p4879_p9 }
 0x10a   : > { %4889 = shalt.err (!%p4886_p12)
}
 0x10b   : > { %4480 = dma.hbm_to_vmem [thread:$0]  (!%p5276_p6), %s6164_s8, 16, %s458_s0, [#allocation15]  }
 0x10c   : > { %s5145_s22 = smov [#allocation19]   ;;  %s5146_s1 = smov [#allocation22]  }
 0x10d   : > { %s478_s2 = sshll.u32 %s5145_s22, 4  ;;  %s502_s25 = sshll.u32 %s5146_s1, 4  ;;  %s479_s2 = int_to_ptr.vmem [resolvable:$true] %s478_s2  ;;  %s503_s25 = int_to_ptr.vmem [resolvable:$true] %s502_s25 }
 0x10e   : > { %s4890_s17 = scalar_lea.hbm %s6123_s10, 512 }
 0x10f   : > { %p4891_p13 = scmp.ne.s32.totalorder %s6123_s10, %s4890_s17  ;;  %p4897_p3 = scmp.lt.u32.totalorder %s4890_s17, %s6123_s10 }
 0x111   : > { %p4893_p0 = pnand %p4891_p13, %p5292_p8 }
 0x113   : > { %p4894_p1 = pneg %p4893_p0 }
 0x115   : > { %p4899_p2 = pnand %p4897_p3, %p4894_p1 }
 0x117   : > { %4902 = shalt.err (!%p4899_p2)
}
 0x118   : > { %s4903_s0 = scalar_lea.vmem %s479_s2, 512  ;;  %p4911_p4 = scmp.lt.s32.totalorder %s479_s2, %s479_s2 }
 0x119   : > { %p4904_p5 = scmp.ne.s32.totalorder %s479_s2, %s4903_s0  ;;  %p4912_p10 = scmp.lt.s32.totalorder %s4903_s0, %s4903_s0 }
 0x11b   : > { %p4906_p7 = pnand %p4904_p5, %p5292_p8  ;;  %p4913_p11 = por %p4912_p10, %p4911_p4 }
 0x11d   : > { %p4907_p9 = pneg %p4906_p7 }
 0x11f   : > { %p4914_p12 = pnand %p4913_p11, %p4907_p9 }
 0x121   : > { %4917 = shalt.err (!%p4914_p12)
}
 0x122   : > { %4486 = dma.hbm_to_vmem [thread:$0]  (!%p5276_p6), %s6123_s10, 512, %s479_s2, [#allocation18], %s6162_s26, %s6162_s26, %s5138_s20  }
 0x123   : > { %s4918_s29 = scalar_lea.hbm %s6125_s12, 1024 }
 0x124   : > { %p4919_p13 = scmp.ne.s32.totalorder %s6125_s12, %s4918_s29  ;;  %p4925_p3 = scmp.lt.u32.totalorder %s4918_s29, %s6125_s12 }
 0x126   : > { %p4921_p0 = pnand %p4919_p13, %p5292_p8 }
 0x128   : > { %p4922_p1 = pneg %p4921_p0 }
 0x12a   : > { %p4927_p2 = pnand %p4925_p3, %p4922_p1 }
 0x12c   : > { %4930 = shalt.err (!%p4927_p2)
}
 0x12d   : > { %s4931_s28 = scalar_lea.vmem %s503_s25, 1024  ;;  %p4939_p4 = scmp.lt.s32.totalorder %s503_s25, %s503_s25 }
 0x12e   : > { %p4932_p5 = scmp.ne.s32.totalorder %s503_s25, %s4931_s28  ;;  %p4940_p10 = scmp.lt.s32.totalorder %s4931_s28, %s4931_s28 }
 0x130   : > { %p4934_p7 = pnand %p4932_p5, %p5292_p8  ;;  %p4941_p11 = por %p4940_p10, %p4939_p4 }
 0x132   : > { %p4935_p9 = pneg %p4934_p7 }
 0x134   : > { %p4942_p12 = pnand %p4941_p11, %p4935_p9 }
 0x136   : > { %4945 = shalt.err (!%p4942_p12)
}
 0x137   : > { %4492 = dma.hbm_to_vmem [thread:$0]  (!%p5276_p6), %s6125_s12, 1024, %s503_s25, [#allocation21], %s6162_s26, %s6162_s26, %s5138_s20  }
 0x138   : > { %s5147_s24 = smov [#allocation23]   ;;  %s4946_s29 = scalar_lea.hbm %s6126_s13, 16 }
 0x139   : > { %s516_s22 = sshll.u32 %s5147_s24, 4  ;;  %p4947_p13 = scmp.ne.s32.totalorder %s6126_s13, %s4946_s29  ;;  %s517_s22 = int_to_ptr.vmem [resolvable:$true] %s516_s22 }
 0x13a   : > { %p4953_p3 = scmp.lt.u32.totalorder %s4946_s29, %s6126_s13 }
 0x13b   : > { %p4949_p0 = pnand %p4947_p13, %p5292_p8 }
 0x13d   : > { %p4950_p1 = pneg %p4949_p0 }
 0x13f   : > { %p4955_p2 = pnand %p4953_p3, %p4950_p1 }
 0x141   : > { %4958 = shalt.err (!%p4955_p2)
}
 0x142   : > { %s4959_s20 = scalar_lea.vmem %s517_s22, 16  ;;  %s4966_s26 = scalar_lea.vmem %s517_s22, 32 }
 0x143   : > { %p4960_p5 = scmp.ne.s32.totalorder %s517_s22, %s4959_s20  ;;  %p4967_p4 = scmp.lt.s32.totalorder %s517_s22, %s517_s22 }
 0x144   : > { %p4968_p10 = scmp.lt.s32.totalorder %s4966_s26, %s4959_s20 }
 0x145   : > { %p4962_p7 = pnand %p4960_p5, %p5292_p8 }
 0x146   : > { %p4969_p11 = por %p4968_p10, %p4967_p4 }
 0x147   : > { %p4963_p9 = pneg %p4962_p7 }
 0x149   : > { %p4970_p12 = pnand %p4969_p11, %p4963_p9 }
 0x14b   : > { %4973 = shalt.err (!%p4970_p12)
}
 0x14c   : > { %s6165_s21 = sld [smem:[#allocation36_spill]]  ;;  %s6166_s2 = sld [smem:[#allocation37_spill]] }
 0x14d   : > { %4495 = dma.hbm_to_vmem [thread:$0]  (!%p5276_p6), %s6126_s13, 16, %s517_s22, [#allocation24]  }
 0x14e   : > { %s4027_s0 = sadd.s32 4294967294, %s5132_s16   ;;  %s5537_s23 = sadd.s32 1, %s5132_s16  }
 0x14f   : > { %s43_s24 = ssub.s32 %s5132_s16, %s5537_s23  ;;  %s46_s1 = sadd.s32 1, %s5128_s15 }
 0x150   : > { %p44_p8 = scmp.eq.s32.totalorder %s43_s24, 0  ;;  %p53_p13 = scmp.ne.s32.totalorder %s5128_s15, %s5124_s30 }
 0x151   : > { %p54_p0 = scmp.eq.s32.totalorder %s5132_s16, 0  ;;  %p367_p7 = scmp.eq.s32.totalorder %s4027_s0, 1 }
 0x152   : > { %p59_p1 = scmp.ne.s32.totalorder %s5124_s30, %s6165_s21  ;;  %p6168_p2 = scmp.eq.s32.totalorder %s6166_s2, 0 }
 0x153   : > { %s5548_s27 = scalar_select %p44_p8, %s5128_s15, %s46_s1  }
 0x154   : > { %p5550_p3 = por %p54_p0, %p53_p13  ;;  %p5556_p6 = por %p6168_p2, %p59_p1 }
 0x155   : > { %p361_p5 = scmp.eq.s32.totalorder %s6166_s2, 1  ;;  %p4519_p9 = scmp.lt.s32.totalorder %s5132_s16, 2 }
 0x156   : > { %s6169_s22 = scalar_select %p5556_p6, 1, 0 }
 0x157   : > { %s527_s17 = sand.u32 1, %s5128_s15   ;;  %p5563_p4 = por %p361_p5, %p53_p13 }
 0x158   : > { %p5567_p10 = por %p367_p7, %p59_p1  ;;  %s5571_s18 = sshll.u32 %s527_s17, 3 }
 0x159   : > { %s6170_s19 = scalar_select %p5563_p4, 1, 0 }
 0x15a   : > { %s6171_s14 = scalar_select %p5567_p10, 1, 0 }
 0x15b   : > { %s4043_s20 = sshll.u32 %s5132_s16, 7  ;;  %s6172_s28 = sld [smem:[#allocation39_spill]] }
 0x15c   : > { %s531_s2 = scalar_lea.vmem [#allocation2], %s5571_s18  ;;  %p5584_p11 = pnand %p4519_p9, %p5550_p3 }
 0x15d   : > { %s538_s0 = sshll.u32 %s531_s2, 4  ;;  %s6174_s4 = sld [smem:[#allocation40_spill]]  ;;  %s5580_s0 = int_to_ptr.vmem [resolvable:$true] %s538_s0 }
 0x15e   : > { %s545_s25 = sand.u32 1, %s5132_s16   ;;  %s528_s5 = scalar_lea.sflag [#allocation3], %s527_s17 }
 0x15f   : > { %p4976_p8 = pneg %p5584_p11 }
 0x161   : > { %s5577_s21 = scalar_lea.hbm %s6172_s28, %s4043_s20  ;;  %s4979_s7 = scalar_lea.hbm %s6172_s28, 256 }
 0x162   : > { %s4974_s6 = scalar_lea.hbm %s5577_s21, 128  ;;  %p4980_p1 = scmp.lt.u32.totalorder %s5577_s21, %s6172_s28 }
 0x163   : > { %s5591_s26 = scalar_lea.hbm %s6174_s4, %s4043_s20  ;;  %p4975_p12 = scmp.ne.s32.totalorder %s5577_s21, %s4974_s6 }
 0x164   : > { %p4981_p3 = scmp.lt.u32.totalorder %s4979_s7, %s4974_s6  ;;  %p4983_p5 = scmp.lt.u32.totalorder %s4974_s6, %s5577_s21 }
 0x165   : > { %p4977_p13 = pnand %p4976_p8, %p4975_p12 }
 0x166   : > { %p4982_p2 = por %p4981_p3, %p4980_p1 }
 0x167   : > { %p4978_p0 = pneg %p4977_p13 }
 0x168   : > { %p4984_p7 = por %p4983_p5, %p4982_p2 }
 0x16a   : > { %p4985_p9 = pnand %p4984_p7, %p4978_p0 }
 0x16c   : > { %4988 = shalt.err (!%p4985_p9)
}
 0x16d   : > { %s4989_s17 = scalar_lea.vmem %s5580_s0, 128  ;;  %s5148_s20 = smov [#allocation2]  }
 0x16e   : > { %p4990_p12 = scmp.ne.s32.totalorder %s5580_s0, %s4989_s17  ;;  %s4994_s1 = sshll.u32 %s5148_s20, 4  ;;  %s4995_s1 = int_to_ptr.vmem [resolvable:$false] %s4994_s1 }
 0x16f   : > { %s4996_s8 = scalar_lea.vmem %s4995_s1, 256  ;;  %p4997_p4 = scmp.lt.s32.totalorder %s5580_s0, %s4995_s1 }
 0x170   : > { %p4992_p13 = pnand %p4990_p12, %p4976_p8  ;;  %p4998_p1 = scmp.lt.s32.totalorder %s4996_s8, %s4989_s17 }
 0x172   : > { %p4993_p10 = pneg %p4992_p13  ;;  %p4999_p3 = por %p4998_p1, %p4997_p4 }
 0x174   : > { %p5000_p2 = pnand %p4999_p3, %p4993_p10 }
 0x176   : > { %5003 = shalt.err (!%p5000_p2)
}
 0x177   : > { %4499 = dma.hbm_to_vmem [thread:$0]  (!%p5584_p11), %s5577_s21, 128, %s5580_s0, %s528_s5  }
 0x178   : > { %s549_s6 = scalar_lea.vmem [#allocation5], %s5571_s18  ;;  %s546_s29 = scalar_lea.sflag [#allocation6], %s545_s25 }
 0x179   : > { %s556_s7 = sshll.u32 %s549_s6, 4  ;;  %s5004_s2 = scalar_lea.hbm %s5591_s26, 128  ;;  %s557_s7 = int_to_ptr.vmem [resolvable:$true] %s556_s7 }
 0x17a   : > { %p5005_p4 = scmp.ne.s32.totalorder %s5591_s26, %s5004_s2  ;;  %s5009_s20 = scalar_lea.hbm %s6174_s4, 256 }
 0x17b   : > { %p5010_p5 = scmp.lt.u32.totalorder %s5591_s26, %s6174_s4  ;;  %p5011_p7 = scmp.lt.u32.totalorder %s5009_s20, %s5004_s2 }
 0x17c   : > { %p5007_p10 = pnand %p5005_p4, %p4976_p8  ;;  %p5013_p12 = scmp.lt.u32.totalorder %s5004_s2, %s5591_s26 }
 0x17d   : > { %p5012_p9 = por %p5011_p7, %p5010_p5 }
 0x17e   : > { %p5008_p0 = pneg %p5007_p10 }
 0x17f   : > { %p5014_p13 = por %p5013_p12, %p5012_p9 }
 0x181   : > { %p5015_p1 = pnand %p5014_p13, %p5008_p0 }
 0x183   : > { %5018 = shalt.err (!%p5015_p1)
}
 0x184   : > { %s5019_s5 = scalar_lea.vmem %s557_s7, 128  ;;  %s5149_s18 = smov [#allocation5]  }
 0x185   : > { %p5020_p3 = scmp.ne.s32.totalorder %s557_s7, %s5019_s5  ;;  %s5024_s21 = sshll.u32 %s5149_s18, 4  ;;  %s5025_s21 = int_to_ptr.vmem [resolvable:$false] %s5024_s21 }
 0x186   : > { %s5026_s0 = scalar_lea.vmem %s5025_s21, 256  ;;  %p5027_p10 = scmp.lt.s32.totalorder %s557_s7, %s5025_s21 }
 0x187   : > { %p5022_p2 = pnand %p5020_p3, %p4976_p8  ;;  %p5028_p6 = scmp.lt.s32.totalorder %s5026_s0, %s5019_s5 }
 0x189   : > { %p5023_p4 = pneg %p5022_p2  ;;  %p5029_p5 = por %p5028_p6, %p5027_p10 }
 0x18b   : > { %p5030_p7 = pnand %p5029_p5, %p5023_p4 }
 0x18d   : > { %5033 = shalt.err (!%p5030_p7)
}
 0x18e   : > { %4502 = dma.hbm_to_vmem [thread:$0]  (!%p5584_p11), %s5591_s26, 128, %s557_s7, %s546_s29  }
 0x18f   : > { %s6175_s25 = sld [smem:[#allocation38_spill]] }
 0x195   : > { %p6176_p0 = scmp.ne.s32.totalorder %s6175_s25, 0 }
 0x196   : > { %s5644_s6 = sand.u32 (!%p6176_p0), 1, %s5124_s30   ;;  %p6177_p6 = scmp.ne.s32.totalorder (!%p6176_p0), %s6169_s22, 0 }
 0x197   : > { %565 = sbr.rel (%p6176_p0) target bundleno = 4265 (0x10a9), region = 76  ;;  %s5647_s2 = sshll.u32 (!%p6176_p0), %s5644_s6, 3 }
 0x198   : > { %s568_s3 = scalar_lea.sflag (!%p6176_p0), [#allocation3], %s5644_s6  ;;  %s571_s17 = scalar_lea.vmem (!%p6176_p0), [#allocation2], %s5647_s2 }
 0x19e   : > { %5079 = dma.done.wait (%p6177_p6), %s568_s3, 128  }
 0x19f   : > { %5081 = vsyncadd (%p6177_p6), %s568_s3, 4294967168  ;;  %s6178_s24 = sld [smem:[#allocation37_spill]]  ;;  %s580_s29 = scalar_lea.vmem [#allocation5], %s5647_s2 }
 0x1a5   : > { %s576_s26 = sand.u32 1, %s6178_s24  }
 0x1a6   : > { %s577_s7 = scalar_lea.sflag [#allocation6], %s576_s26 }
 0x1a7   : > { %5083 = dma.done.wait (%p6177_p6), %s577_s7, 128  }
 0x1a8   : > { %5085 = vsyncadd (%p6177_p6), %s577_s7, 4294967168  ;;  %p6179_p11 = scmp.eq.s32.totalorder %s6178_s24, 0 }
 0x1aa   : > { %5087 = dma.done.wait (%p6179_p11), [#allocation6], 512   ;;  %p6180_p8 = pmov %p6179_p11 }
 0x1ac   : > { %5089 = vsyncadd (%p6180_p8), [#allocation6], 4294966784  ;;  %p6181_p9 = pmov %p6180_p8 }
 0x1ad   : > { %p6182_p12 = pmov %p6180_p8 }
 0x1ae   : > { %5091 = dma.done.wait (%p6181_p9), [#allocation9], 528  }
 0x1af   : > { %5093 = vsyncadd (%p6182_p12), [#allocation9], 4294966768  ;;  %p6183_p13 = pmov %p6180_p8 }
 0x1b0   : > { %p6184_p1 = pmov %p6180_p8 }
 0x1b1   : > { %5095 = dma.done.wait (%p6183_p13), [#allocation12], 32  }
 0x1b2   : > { %5097 = vsyncadd (%p6184_p1), [#allocation12], 4294967264  ;;  %p6185_p3 = pmov %p6184_p1 }
 0x1b3   : > { %p6186_p2 = pmov %p6184_p1 }
 0x1b4   : > { %5099 = dma.done.wait (%p6185_p3), [#allocation15], 32  }
 0x1b5   : > { %5101 = vsyncadd (%p6186_p2), [#allocation15], 4294967264  ;;  %p6187_p4 = pmov %p6184_p1 }
 0x1b6   : > { %p6188_p10 = pmov %p6184_p1 }
 0x1b7   : > { %5103 = dma.done.wait (%p6187_p4), [#allocation18], 528  }
 0x1b8   : > { %5105 = vsyncadd (%p6188_p10), [#allocation18], 4294966768  ;;  %p6189_p5 = pmov %p6184_p1 }
 0x1b9   : > { %p6190_p7 = pmov %p6184_p1 }
 0x1ba   : > { %5107 = dma.done.wait (%p6189_p5), [#allocation21], 1040  }
 0x1bb   : > { %5109 = vsyncadd (%p6190_p7), [#allocation21], 4294966256  ;;  %p6191_p0 = pmov %p6184_p1 }
 0x1bd   : > { %5111 = dma.done.wait (%p6191_p0), [#allocation24], 16   ;;  %p6192_p6 = pmov %p6191_p0 }
 0x1be   : > { %v5150_v0 = vmov 0.0|0.0   ;;  %vm5151_vm0 = vmmov 0   ;;  %v5152_v1 = vmov 0.0   ;;  %v5695_v2 = vld [vmem:[#allocation7] sm:$0xff]  ;;  %v5697_v3 = vld [vmem:[#allocation7 + $0x8] sm:$0xff]  ;;  %v5699_v4 = vld [vmem:[#allocation7 + $0x10] sm:$0xff]  ;;  %v785_v19 = vlaneseq }
 0x1bf   : > { %5113 = vsyncadd (%p6192_p6), [#allocation24], 4294967280  ;;  %4357 = vmatprep.subr.bf16.mxu1 %v5150_v0  ;;  %4200 = vmatprep.mubr.msk.f32.mxu1 %vm5151_vm0, %v5152_v1  ;;  %v4592_v5 = vpack.i.bf16 %v5697_v3, %v5695_v2  ;;  %v5705_v6 = vpack.c.bf16 %v5697_v3, %v5695_v2  ;;  %v5707_v7 = vld [vmem:[#allocation7 + $0x18] sm:$0xff]  ;;  %v678_v9 = vld [vmem:[%s571_s17] sm:$0xff]  ;;  %vm696_vm1 = vcmask 261120   ;;  %s5153_s22 = smov 104  }
 0x1c0   : > { %4213 = vmatprep.subr.mxu0 %v5152_v1  ;;  %4215 = vmatprep.mubr.msk.f32.mxu0 %vm5151_vm0, %v5152_v1  ;;  %v5712_v8 = vpack.c.bf16 %v5707_v7, %v5699_v4  ;;  %v5722_v10 = vld [vmem:[#allocation8] ss:$0 sm:$0xff]  ;;  %s5154_s20 = smov 120   ;;  %s5155_s1 = smov 96   ;;  %v5158_v17 = vmov 1983009808  }
 0x1c1   : > { %4359 = vmatpush3.bf16.msra.mxu1 %v5705_v6  ;;  %s5156_s8 = smov 112   ;;  %s5157_s5 = smov 64   ;;  %v783_v18 = vunpack.c.l.s4 %v5158_v17  ;;  %v5741_v21 = vshrl.u32 %v785_v19, 7  ;;  %v5159_v22 = vmov 1934713408   ;;  %vm1212_vm2 = vcmask 64512  }
 0x1c2   : > { %4360 = vmatprep.subr.bf16.mxu1 %v5150_v0  ;;  %v815_v23 = vunpack.c.l.s4 %v5159_v22  ;;  %s5160_s18 = smov 16   ;;  %s5161_s21 = smov 8   ;;  %vm2016_vm4 = vcmask 130048   ;;  %vm2018_vm5 = vcmask 195584   ;;  %vm3731_vm6 = vcmask 523264  }
 0x1c3   : > { %v784_v20 = vunpack.c.0.s8 %v783_v18  ;;  %s5162_s0 = smov 24   ;;  %s4118_s25 = sshll.u32 %s6178_s24, 7 }
 0x1c4   : > { %v816_v29 = vunpack.c.0.s8 %v815_v23  ;;  %s677_s3 = scalar_lea.vmem [#allocation25], %s5647_s2  ;;  %p6195_p8 = scmp.ne.s32.totalorder %s6170_s19, 0 }
 0x1c5   : > { %4362 = vmatpush3.bf16.msra.mxu1 %v5712_v8  ;;  %v5746_v26 = vsub.s32 %v784_v20, %v5741_v21  ;;  %s3820_s17 = sshll.u32 %s677_s3, 4  ;;  %s5163_s2 = smov [#allocation25]   ;;  %s6070_s17 = int_to_ptr.vmem [resolvable:$true] %s3820_s17 }
 0x1c6   : > { %4203 = vmatprep.subr.mxu1 %v5152_v1  ;;  %v5755_v34 = vsub.s32 %v816_v29, %v5741_v21  ;;  %s5038_s24 = sshll.u32 %s5163_s2, 4  ;;  %s5039_s24 = int_to_ptr.vmem [resolvable:$false] %s5038_s24 }
 0x1c7   : > { %p5041_p13 = scmp.lt.s32.totalorder %s6070_s17, %s5039_s24 }
 0x1c8   : > { %4201 = vmatmul.mubr.msk.f32.vlgmr.msra.gmra.mrb[0].mxu1 %vm696_vm1, %v678_v9 }
 0x1c9   : > { %4205 = vmatprep.mubr.msk.f32.mxu1 %vm5151_vm0, %v5152_v1 }
 0x29b   : > { %v766_v11 = vpop.f32.mrb[0].mxu1 }
 0x29c   : > { %v767_v12 = vadd.f32 %v5722_v10, %v766_v11  ;;  %v4202_v13 = vpop.f32.mrb[1].mxu1 }
 0x29e   : > { %777 = vrot.lane.b32.xlu1 %v767_v12, %s5153_s22  ;;  %771 = vrot.lane.b32.xlu0 %v767_v12, %s5154_s20 }
 0x2a2   : > { %916 = vrot.lane.b32.xlu1 %v767_v12, %s5155_s1  ;;  %774 = vrot.lane.b32.xlu0 %v767_v12, %s5156_s8 }
 0x310   : > { %v772_v14 = vpop.permute.xlu0 %771  ;;  %v5730_v15 = vpop.permute.xlu1 %777 }
 0x311   : > { %918 = vrot.lane.b32.xlu0 %v772_v14, %s5155_s1  ;;  %v796_v27 = vcombine.low %v772_v14, %v5730_v15  ;;  %v797_v28 = vcombine.high %v772_v14, %v5730_v15 }
 0x313   : > { %v804_v32 = vrot.slane %v796_v27, %v5746_v26  ;;  %v811_v33 = vrot.slane %v797_v28, %v5746_v26 }
 0x314   : > { %v5732_v16 = vpop.permute.xlu0 %774  ;;  %v917_v35 = vpop.permute.xlu1 %916 }
 0x315   : > { %922 = vrot.lane.b32.xlu0 %v5730_v15, %s5155_s1  ;;  %920 = vrot.lane.b32.xlu1 %v5732_v16, %s5155_s1  ;;  %v780_v24 = vcombine.low %v767_v12, %v5732_v16  ;;  %v781_v25 = vcombine.high %v767_v12, %v5732_v16 }
 0x317   : > { %v788_v30 = vrot.slane %v780_v24, %v5746_v26  ;;  %v795_v31 = vrot.slane %v781_v25, %v5746_v26 }
 0x319   : > { %1064 = vrot.lane.b32.xlu0 %v767_v12, %s5157_s5  ;;  %1066 = vrot.lane.b32.xlu1 %v772_v14, %s5157_s5  ;;  %v812_v36 = vcombine.low %v788_v30, %v804_v32  ;;  %v813_v37 = vcombine.high %v788_v30, %v804_v32  ;;  %v828_v38 = vcombine.low %v795_v31, %v811_v33 }
 0x31a   : > { %v829_v39 = vcombine.high %v795_v31, %v811_v33 }
 0x31b   : > { %v820_v41 = vrot.slane %v812_v36, %v5755_v34  ;;  %v827_v42 = vrot.slane %v813_v37, %v5755_v34  ;;  %v836_v43 = vrot.slane %v828_v38, %v5755_v34 }
 0x31c   : > { %v843_v44 = vrot.slane %v829_v39, %v5755_v34 }
 0x31d   : > { %v848_v55 = vcombine.low %v820_v41, %v827_v42  ;;  %v4064_v56 = vcombine.high %v820_v41, %v827_v42 }
 0x31e   : > { %v864_v57 = vcombine.low %v836_v43, %v843_v44  ;;  %v4065_v58 = vcombine.high %v836_v43, %v843_v44 }
 0x31f   : > { %v855_v13 = vrot.slane %v848_v55, %v5746_v26  ;;  %v863_v14 = vrot.slane %v4064_v56, %v5746_v26  ;;  %v1524_v55 = vand.u32 127, %v785_v19 }
 0x320   : > { %v871_v17 = vrot.slane %v864_v57, %v5746_v26  ;;  %v879_v18 = vrot.slane %v4065_v58, %v5746_v26 }
 0x321   : > { %v880_v30 = vcombine.low %v855_v13, %v863_v14  ;;  %v881_v32 = vcombine.high %v855_v13, %v863_v14  ;;  %vm1525_vm3 = vcmp.gt.s32.totalorder %v1524_v55, %v5741_v21 }
 0x322   : > { %v896_v31 = vcombine.low %v871_v17, %v879_v18  ;;  %v897_v33 = vcombine.high %v871_v17, %v879_v18  ;;  %v1526_v58 = vsel %vm1525_vm3, -1e+09, %v5152_v1 }
 0x323   : > { %v888_v43 = vrot.slane %v880_v30, %v5755_v34 }
 0x324   : > { %v904_v44 = vrot.slane %v896_v31, %v5755_v34 }
 0x383   : > { %v919_v40 = vpop.permute.xlu0 %918 }
 0x387   : > { %v921_v45 = vpop.permute.xlu1 %920  ;;  %v923_v46 = vpop.permute.xlu0 %922 }
 0x388   : > { %v928_v47 = vcombine.low %v917_v35, %v921_v45  ;;  %v929_v48 = vcombine.high %v917_v35, %v921_v45  ;;  %v944_v49 = vcombine.low %v919_v40, %v923_v46  ;;  %v945_v50 = vcombine.high %v919_v40, %v923_v46 }
 0x389   : > { %v895_v45 = vrot.slane %v881_v32, %v5755_v34  ;;  %v911_v46 = vrot.slane %v897_v33, %v5755_v34 }
 0x38a   : > { %v936_v51 = vrot.slane %v928_v47, %v5746_v26  ;;  %v943_v52 = vrot.slane %v929_v48, %v5746_v26  ;;  %v952_v53 = vrot.slane %v944_v49, %v5746_v26  ;;  %v959_v54 = vrot.slane %v945_v50, %v5746_v26 }
 0x38b   : > { %v912_v49 = vcombine.low %v888_v43, %v904_v44  ;;  %v914_v50 = vcombine.low %v895_v45, %v911_v46 }
 0x38c   : > { %v960_v59 = vcombine.low %v936_v51, %v952_v53  ;;  %v961_v60 = vcombine.high %v936_v51, %v952_v53  ;;  %v976_v61 = vcombine.low %v943_v52, %v959_v54  ;;  %v977_v62 = vcombine.high %v943_v52, %v959_v54 }
 0x38d   : > { %v913_v52 = vcombine.high %v888_v43, %v904_v44  ;;  %v915_v54 = vcombine.high %v895_v45, %v911_v46 }
 0x38e   : > { %v968_v63 = vrot.slane %v960_v59, %v5755_v34  ;;  %v975_v9 = vrot.slane %v961_v60, %v5755_v34  ;;  %v984_v11 = vrot.slane %v976_v61, %v5755_v34  ;;  %v991_v12 = vrot.slane %v977_v62, %v5755_v34 }
 0x390   : > { %v996_v20 = vcombine.low %v968_v63, %v975_v9  ;;  %v4066_v22 = vcombine.high %v968_v63, %v975_v9  ;;  %v1012_v23 = vcombine.low %v984_v11, %v991_v12  ;;  %v4067_v24 = vcombine.high %v984_v11, %v991_v12 }
 0x392   : > { %v1003_v25 = vrot.slane %v996_v20, %v5746_v26  ;;  %v1011_v27 = vrot.slane %v4066_v22, %v5746_v26  ;;  %v1019_v28 = vrot.slane %v1012_v23, %v5746_v26  ;;  %v1027_v29 = vrot.slane %v4067_v24, %v5746_v26 }
 0x394   : > { %v1028_v35 = vcombine.low %v1003_v25, %v1011_v27  ;;  %v1044_v36 = vcombine.low %v1019_v28, %v1027_v29  ;;  %v1029_v37 = vcombine.high %v1003_v25, %v1011_v27  ;;  %v1045_v38 = vcombine.high %v1019_v28, %v1027_v29  ;;  %v1067_v25 = vpop.permute.xlu1 %1066  ;;  %v1065_v27 = vpop.permute.xlu0 %1064 }
 0x396   : > { %v1036_v39 = vrot.slane %v1028_v35, %v5755_v34  ;;  %v1052_v40 = vrot.slane %v1044_v36, %v5755_v34  ;;  %v1043_v41 = vrot.slane %v1029_v37, %v5755_v34  ;;  %v1059_v42 = vrot.slane %v1045_v38, %v5755_v34 }
 0x398   : > { %v1060_v47 = vcombine.low %v1036_v39, %v1052_v40  ;;  %v1062_v48 = vcombine.low %v1043_v41, %v1059_v42  ;;  %v1061_v51 = vcombine.high %v1036_v39, %v1052_v40  ;;  %v1063_v53 = vcombine.high %v1043_v41, %v1059_v42 }
 0x39a   : > { %4204 = vmatpush3.xpose.msk.msra.mxu1 %vm1212_vm2, %v1060_v47  ;;  %4214 = vmatpush3.xpose.msk.msra.mxu0 %vm1212_vm2, %v1062_v48 }
 0x39b   : > { %4208 = vmatprep.subr.mxu1 %v5152_v1  ;;  %4223 = vmatprep.subr.mxu0 %v5152_v1 }
 0x39d   : > { %4206 = vmatmul.mubr.msk.f32.vlgmr.msra.gmra.mrb[2].mxu1 %vm1212_vm2, %v912_v49  ;;  %4216 = vmatmul.mubr.msk.f32.vlgmr.msra.gmra.mrb[0].mxu0 %vm1212_vm2, %v914_v50 }
 0x39e   : > { %4209 = vmatpush3.xpose.msk.msra.mxu1 %vm1212_vm2, %v1061_v51  ;;  %4210 = vmatprep.mubr.msk.f32.mxu1 %vm5151_vm0, %v5152_v1 }
 0x39f   : > { %4218 = vmatprep.subr.mxu1 %v5152_v1  ;;  %4225 = vmatprep.mubr.msk.f32.mxu0 %vm5151_vm0, %v5152_v1 }
 0x3a1   : > { %4211 = vmatmul.mubr.msk.f32.vlgmr.msra.gmra.mrb[4].mxu1 %vm1212_vm2, %v913_v52 }
 0x3a2   : > { %4219 = vmatpush3.xpose.msk.msra.mxu1 %vm1212_vm2, %v1063_v53  ;;  %4220 = vmatprep.mubr.msk.f32.mxu1 %vm5151_vm0, %v5152_v1 }
 0x3a3   : > { %4228 = vmatprep.subr.mxu1 %v5152_v1 }
 0x3a5   : > { %4221 = vmatmul.mubr.msk.f32.vlgmr.msra.gmra.mrb[6].mxu1 %vm1212_vm2, %v915_v54 }
 0x3a6   : > { %4230 = vmatprep.mubr.msk.f32.mxu1 %vm5151_vm0, %v5152_v1 }
 0x470   : > { %v1285_v56 = vpop.f32.mrb[2].mxu1  ;;  %v1437_v57 = vpop.f32.mrb[0].mxu0 }
 0x471   : > { %v1517_v59 = vmul.f32 0.35355338, %v1285_v56  ;;  %v1519_v60 = vmul.f32 0.35355338, %v1437_v57  ;;  %v4207_v61 = vpop.f32.mrb[3].mxu1  ;;  %v4217_v62 = vpop.f32.mrb[1].mxu0 }
 0x473   : > { %v1529_v63 = vadd.f32 %v1526_v58, %v1519_v60  ;;  %v1527_v9 = vadd.f32 %v1526_v58, %v1517_v59 }
 0x474   : > { %v1361_v11 = vpop.f32.mrb[4].mxu1 }
 0x475   : > { %v1518_v12 = vmul.f32 0.35355338, %v1361_v11  ;;  %v4212_v13 = vpop.f32.mrb[5].mxu1  ;;  %v1537_v14 = vsel %vm1212_vm2, %v1529_v63, -inf  ;;  %v1531_v17 = vsel %vm1212_vm2, %v1527_v9, -inf }
 0x476   : > { %1538 = vmax.xlane.f32.xlu0 %v1537_v14  ;;  %1532 = vmax.xlane.f32.xlu1 %v1531_v17 }
 0x477   : > { %v1528_v19 = vadd.f32 %v1526_v58, %v1518_v12 }
 0x478   : > { %v1513_v21 = vpop.f32.mrb[6].mxu1 }
 0x479   : > { %v1520_v18 = vmul.f32 0.35355338, %v1513_v21  ;;  %v4222_v20 = vpop.f32.mrb[7].mxu1  ;;  %v1534_v22 = vsel %vm1212_vm2, %v1528_v19, -inf }
 0x47a   : > { %1535 = vmax.xlane.f32.xlu0 %v1534_v22 }
 0x47b   : > { %v1530_v23 = vadd.f32 %v1526_v58, %v1520_v18 }
 0x47d   : > { %v1540_v24 = vsel %vm1212_vm2, %v1530_v23, -inf }
 0x47e   : > { %1541 = vmax.xlane.f32.xlu1 %v1540_v24 }
 0x48f   : > { %1068 = vrot.lane.b32.xlu1 %v5732_v16, %s5157_s5 }
 0x490   : > { %1070 = vrot.lane.b32.xlu0 %v5730_v15, %s5157_s5  ;;  %s5040_s5 = scalar_lea.vmem %s5039_s24, 256 }
 0x503   : > { %v1539_v28 = vpop.xlane.xlu0 %1538  ;;  %v1533_v29 = vpop.xlane.xlu1 %1532 }
 0x504   : > { %v1543_v30 = vsub.f32 %v1527_v9, %v1533_v29  ;;  %v1545_v31 = vsub.f32 %v1529_v63, %v1539_v28 }
 0x506   : > { %v1547_v32 = vmul.f32 1.442695, %v1543_v30  ;;  %v1551_v36 = vmul.f32 1.442695, %v1545_v31 }
 0x507   : > { %v1536_v33 = vpop.xlane.xlu0 %1535 }
 0x508   : > { %v1544_v35 = vsub.f32 %v1528_v19, %v1536_v33  ;;  %4602 = vpow2.f32 %v1547_v32 }
 0x50a   : > { %v1549_v37 = vmul.f32 1.442695, %v1544_v35  ;;  %v685_v35 = vld [vmem:[#allocation10] sm:$0xff] }
 0x50b   : > { %v1071_v38 = vpop.permute.xlu0 %1070  ;;  %v1542_v39 = vpop.xlane.xlu1 %1541 }
 0x50c   : > { %4604 = vpow2.f32 %v1549_v37  ;;  %v1546_v40 = vsub.f32 %v1530_v23, %v1542_v39  ;;  %v1092_v16 = vcombine.low %v1067_v25, %v1071_v38  ;;  %v1093_v41 = vcombine.high %v1067_v25, %v1071_v38 }
 0x50d   : > { %4606 = vpow2.f32 %v1551_v36  ;;  %v686_v36 = vld [vmem:[#allocation10 + $0x8] sm:$0xff] }
 0x50e   : > { %v1553_v15 = vmul.f32 1.442695, %v1546_v40  ;;  %v1100_v45 = vrot.slane %v1092_v16, %v5746_v26  ;;  %v1107_v46 = vrot.slane %v1093_v41, %v5746_v26  ;;  %v5856_v37 = vpack.c.bf16 %v686_v36, %v685_v35 }
 0x50f   : > { %v1069_v42 = vpop.permute.xlu1 %1068 }
 0x510   : > { %4608 = vpow2.f32 %v1553_v15  ;;  %v1076_v43 = vcombine.low %v1065_v27, %v1069_v42  ;;  %v1077_v44 = vcombine.high %v1065_v27, %v1069_v42 }
 0x512   : > { %v1084_v47 = vrot.slane %v1076_v43, %v5746_v26  ;;  %v1091_v48 = vrot.slane %v1077_v44, %v5746_v26  ;;  %v4603_v49 = vpop.eup %4602 }
 0x513   : > { %v1555_v54 = vsel %vm1212_vm2, %v4603_v49, 0.0 }
 0x514   : > { %v1108_v50 = vcombine.low %v1084_v47, %v1100_v45  ;;  %v1109_v51 = vcombine.high %v1084_v47, %v1100_v45  ;;  %v1124_v52 = vcombine.low %v1091_v48, %v1107_v46  ;;  %v1125_v53 = vcombine.high %v1091_v48, %v1107_v46  ;;  %1556 = vadd.xlane.f32.xlu1 %v1555_v54 }
 0x516   : > { %v4605_v55 = vpop.eup %4604  ;;  %v1116_v56 = vrot.slane %v1108_v50, %v5755_v34  ;;  %v1123_v57 = vrot.slane %v1109_v51, %v5755_v34  ;;  %v1132_v58 = vrot.slane %v1124_v52, %v5755_v34  ;;  %v1139_v59 = vrot.slane %v1125_v53, %v5755_v34 }
 0x517   : > { %v1558_v60 = vsel %vm1212_vm2, %v4605_v55, 0.0  ;;  %v4607_v61 = vpop.eup %4606 }
 0x518   : > { %v1144_v62 = vcombine.low %v1116_v56, %v1123_v57  ;;  %v4068_v63 = vcombine.high %v1116_v56, %v1123_v57  ;;  %v1160_v9 = vcombine.low %v1132_v58, %v1139_v59  ;;  %v4069_v11 = vcombine.high %v1132_v58, %v1139_v59  ;;  %1559 = vadd.xlane.f32.xlu0 %v1558_v60 }
 0x519   : > { %v1561_v21 = vsel %vm1212_vm2, %v4607_v61, 0.0 }
 0x51a   : > { %v4609_v12 = vpop.eup %4608  ;;  %v1151_v13 = vrot.slane %v1144_v62, %v5746_v26  ;;  %v1159_v14 = vrot.slane %v4068_v63, %v5746_v26  ;;  %v1167_v17 = vrot.slane %v1160_v9, %v5746_v26  ;;  %v1175_v19 = vrot.slane %v4069_v11, %v5746_v26 }
 0x51b   : > { %v1564_v18 = vsel %vm1212_vm2, %v4609_v12, 0.0 }
 0x51c   : > { %1562 = vadd.xlane.f32.xlu0 %v1561_v21  ;;  %1565 = vadd.xlane.f32.xlu1 %v1564_v18  ;;  %v1176_v20 = vcombine.low %v1151_v13, %v1159_v14  ;;  %v1192_v22 = vcombine.low %v1167_v17, %v1175_v19  ;;  %v1177_v23 = vcombine.high %v1151_v13, %v1159_v14  ;;  %v688_v13 = vld [vmem:[#allocation10 + $0x18] sm:$0xff] }
 0x51d   : > { %v1193_v24 = vcombine.high %v1167_v17, %v1175_v19 }
 0x51e   : > { %v1184_v25 = vrot.slane %v1176_v20, %v5755_v34  ;;  %v1200_v27 = vrot.slane %v1192_v22, %v5755_v34  ;;  %v1191_v28 = vrot.slane %v1177_v23, %v5755_v34 }
 0x51f   : > { %v1207_v29 = vrot.slane %v1193_v24, %v5755_v34 }
 0x520   : > { %v1208_v30 = vcombine.low %v1184_v25, %v1200_v27  ;;  %v1209_v31 = vcombine.high %v1184_v25, %v1200_v27 }
 0x521   : > { %v1210_v32 = vcombine.low %v1191_v28, %v1207_v29  ;;  %v1211_v33 = vcombine.high %v1191_v28, %v1207_v29 }
 0x522   : > { %4224 = vmatpush3.msra.mxu0 %v1208_v30  ;;  %4229 = vmatpush3.msra.mxu1 %v1209_v31 }
 0x523   : > { %4226 = vmatmul.mubr.msk.f32.vlgmr.msra.gmra.mrb[2].mxu0 %vm1212_vm2, %v4603_v49  ;;  %4231 = vmatmul.mubr.msk.f32.vlgmr.msra.gmra.mrb[8].mxu1 %vm1212_vm2, %v4605_v55 }
 0x524   : > { %4233 = vmatprep.subr.mxu0 %v5152_v1  ;;  %4238 = vmatprep.subr.mxu1 %v5152_v1 }
 0x525   : > { %4234 = vmatpush3.msra.mxu0 %v1210_v32  ;;  %4239 = vmatpush3.msra.mxu1 %v1211_v33 }
 0x526   : > { %4235 = vmatprep.mubr.msk.f32.mxu0 %vm5151_vm0, %v5152_v1  ;;  %4240 = vmatprep.mubr.msk.f32.mxu1 %vm5151_vm0, %v5152_v1 }
 0x527   : > { %4236 = vmatmul.mubr.msk.f32.vlgmr.msra.gmra.mrb[4].mxu0 %vm1212_vm2, %v4607_v61  ;;  %4241 = vmatmul.mubr.msk.f32.vlgmr.msra.gmra.mrb[10].mxu1 %vm1212_vm2, %v4609_v12  ;;  %v687_v12 = vld [vmem:[#allocation10 + $0x10] sm:$0xff] }
 0x528   : > { %4363 = vmatprep.subr.bf16.mxu0 %v5150_v0  ;;  %4251 = vmatprep.mubr.msk.f32.mxu0 %vm5151_vm0, %v5152_v1  ;;  %v5868_v18 = vpack.c.bf16 %v688_v13, %v687_v12  ;;  %v4087_v13 = vld [vmem:[#allocation14] ss:$0 sm:$0xff] }
 0x529   : > { %4369 = vmatprep.subr.bf16.mxu1 %v5150_v0  ;;  %4262 = vmatprep.mubr.msk.f32.mxu1 %vm5151_vm0, %v5152_v1 }
 0x52a   : > { %4371 = vmatpush3.bf16.msra.mxu1 %v5705_v6  ;;  %4365 = vmatpush3.bf16.msra.mxu0 %v5856_v37 }
 0x52b   : > { %4372 = vmatprep.subr.bf16.mxu1 %v5150_v0  ;;  %4366 = vmatprep.subr.bf16.mxu0 %v5150_v0 }
 0x52e   : > { %4374 = vmatpush3.bf16.msra.mxu1 %v5712_v8  ;;  %4368 = vmatpush3.bf16.msra.mxu0 %v5868_v18 }
 0x52f   : > { %4276 = vmatprep.subr.mxu1 %v5152_v1  ;;  %4375 = vmatprep.subr.bf16.mxu0 %v5150_v0 }
 0x5a1   : > { %v1557_v39 = vpop.xlane.xlu1 %1556 }
 0x5a2   : > { %4610 = vrcp.f32 %v1557_v39 }
 0x5a5   : > { %v1560_v38 = vpop.xlane.xlu0 %1559 }
 0x5a6   : > { %4612 = vrcp.f32 %v1560_v38 }
 0x5a9   : > { %v1563_v40 = vpop.xlane.xlu0 %1562  ;;  %v1566_v16 = vpop.xlane.xlu1 %1565 }
 0x5aa   : > { %4614 = vrcp.f32 %v1563_v40 }
 0x5ab   : > { %4616 = vrcp.f32 %v1566_v16 }
 0x5ac   : > { %v4611_v41 = vpop.eup %4610 }
 0x5b0   : > { %v4613_v43 = vpop.eup %4612 }
 0x5b4   : > { %v4615_v44 = vpop.eup %4614 }
 0x5b5   : > { %v4617_v45 = vpop.eup %4616 }
 0x5f6   : > { %v1636_v6 = vpop.f32.mrb[2].mxu0  ;;  %v1709_v8 = vpop.f32.mrb[8].mxu1 }
 0x5f7   : > { %v4227_v15 = vpop.f32.mrb[3].mxu0  ;;  %v4232_v42 = vpop.f32.mrb[9].mxu1  ;;  %v1863_v48 = vmul.f32 %v4611_v41, %v1636_v6  ;;  %v1864_v49 = vmul.f32 %v4613_v43, %v1709_v8 }
 0x5fa   : > { %v1782_v46 = vpop.f32.mrb[4].mxu0  ;;  %v1855_v47 = vpop.f32.mrb[10].mxu1 }
 0x5fb   : > { %v1865_v50 = vmul.f32 %v4615_v44, %v1782_v46  ;;  %v1866_v51 = vmul.f32 %v4617_v45, %v1855_v47  ;;  %v4237_v52 = vpop.f32.mrb[5].mxu0  ;;  %v4242_v53 = vpop.f32.mrb[11].mxu1  ;;  %v5889_v46 = vld [vmem:[#allocation11] ss:$0 sm:$0xff] }
 0x5fd   : > { %v1867_v54 = vcombine.low %v1863_v48, %v1865_v50  ;;  %v1868_v55 = vcombine.high %v1863_v48, %v1865_v50  ;;  %v1883_v56 = vcombine.low %v1864_v49, %v1866_v51  ;;  %v1884_v57 = vcombine.high %v1864_v49, %v1866_v51 }
 0x5ff   : > { %v1875_v58 = vrot.slane %v1867_v54, %v5746_v26  ;;  %v1882_v59 = vrot.slane %v1868_v55, %v5746_v26  ;;  %v1891_v60 = vrot.slane %v1883_v56, %v5746_v26  ;;  %v1898_v61 = vrot.slane %v1884_v57, %v5746_v26 }
 0x600   : > { %v4597_v56 = vpack.i.bf16 %v5707_v7, %v5699_v4  ;;  %v679_v4 = vld [vmem:[%s580_s29] sm:$0xff]  ;;  %s6193_s29 = sld [smem:[#allocation48_spill]] }
 0x601   : > { %v1899_v62 = vcombine.low %v1875_v58, %v1891_v60  ;;  %v1900_v63 = vcombine.high %v1875_v58, %v1891_v60  ;;  %v1915_v9 = vcombine.low %v1882_v59, %v1898_v61  ;;  %v1916_v11 = vcombine.high %v1882_v59, %v1898_v61 }
 0x603   : > { %v1907_v14 = vrot.slane %v1899_v62, %v5755_v34  ;;  %v1914_v17 = vrot.slane %v1900_v63, %v5755_v34  ;;  %v1923_v19 = vrot.slane %v1915_v9, %v5755_v34  ;;  %v1930_v21 = vrot.slane %v1916_v11, %v5755_v34  ;;  %v4086_v11 = vld [vmem:[#allocation13] ss:$0 sm:$0xff] }
 0x605   : > { %v1935_v20 = vcombine.low %v1907_v14, %v1914_v17  ;;  %v4082_v22 = vcombine.high %v1907_v14, %v1914_v17  ;;  %v1951_v23 = vcombine.low %v1923_v19, %v1930_v21  ;;  %v4083_v24 = vcombine.high %v1923_v19, %v1930_v21 }
 0x607   : > { %v1942_v25 = vrot.slane %v1935_v20, %v5746_v26  ;;  %v1950_v27 = vrot.slane %v4082_v22, %v5746_v26  ;;  %v1958_v28 = vrot.slane %v1951_v23, %v5746_v26  ;;  %v1966_v29 = vrot.slane %v4083_v24, %v5746_v26 }
 0x609   : > { %v1968_v30 = vcombine.high %v1942_v25, %v1950_v27  ;;  %v1984_v31 = vcombine.high %v1958_v28, %v1966_v29  ;;  %v1967_v32 = vcombine.low %v1942_v25, %v1950_v27  ;;  %v1983_v33 = vcombine.low %v1958_v28, %v1966_v29 }
 0x60b   : > { %v1982_v35 = vrot.slane %v1968_v30, %v5755_v34  ;;  %v1998_v36 = vrot.slane %v1984_v31, %v5755_v34  ;;  %v1975_v38 = vrot.slane %v1967_v32, %v5755_v34  ;;  %v1991_v39 = vrot.slane %v1983_v33, %v5755_v34 }
 0x60d   : > { %v2001_v40 = vcombine.low %v1982_v35, %v1998_v36  ;;  %v2000_v16 = vcombine.high %v1975_v38, %v1991_v39  ;;  %v2002_v6 = vcombine.high %v1982_v35, %v1998_v36  ;;  %v1999_v8 = vcombine.low %v1975_v38, %v1991_v39 }
 0x60f   : > { %2008 = vrot.lane.b32.xlu1 %v2001_v40, %s5160_s18  ;;  %2004 = vrot.lane.b32.xlu0 %v2000_v16, %s5161_s21 }
 0x613   : > { %2012 = vrot.lane.b32.xlu1 %v2002_v6, %s5162_s0 }
 0x681   : > { %v2009_v41 = vpop.permute.xlu1 %2008  ;;  %v2005_v15 = vpop.permute.xlu0 %2004 }
 0x682   : > { %v2015_v42 = vsel %vm1212_vm2, %v1999_v8, %v2005_v15 }
 0x683   : > { %v2017_v44 = vsel %vm2016_vm4, %v2015_v42, %v2009_v41 }
 0x685   : > { %v2013_v43 = vpop.permute.xlu1 %2012 }
 0x686   : > { %v2019_v45 = vsel %vm2018_vm5, %v2017_v44, %v2013_v43 }
 0x687   : > { %4252 = vmatmul.mubr.msk.f32.vlgmr.msra.gmra.mrb[6].mxu0 %vm696_vm1, %v2019_v45 }
 0x688   : > { %4273 = vmatprep.mubr.msk.f32.mxu0 %vm5151_vm0, %v5152_v1 }
 0x75a   : > { %v2095_v47 = vpop.f32.mrb[6].mxu0 }
 0x75b   : > { %v2096_v48 = vadd.f32 %v5889_v46, %v2095_v47  ;;  %v4253_v49 = vpop.f32.mrb[7].mxu0 }
 0x75d   : > { %v2101_v50 = vsel %vm696_vm1, %v2096_v48, 0.0 }
 0x75e   : > { %2102 = vadd.xlane.f32.xlu0 %v2101_v50 }
 0x774   : > { %4593 = vrot.lane.b32.xlu0 %v4592_v5, %s5155_s1 }
 0x778   : > { %2218 = vrot.lane.b32.xlu0 %v5722_v10, %s5155_s1 }
 0x7eb   : > { %v2103_v51 = vpop.xlane.xlu0 %2102 }
 0x7ec   : > { %v2105_v52 = vmul.f32 0.03125, %v2103_v51 }
 0x7ee   : > { %v2106_v53 = vsub.f32 %v2096_v48, %v2105_v52 }
 0x7ef   : > { %v4594_v57 = vpop.permute.xlu0 %4593 }
 0x7f0   : > { %v2107_v54 = vmul.f32 %v2106_v53, %v2106_v53  ;;  %v4596_v58 = vunpack.i.h.bf16 %v4594_v57  ;;  %v4595_v59 = vunpack.i.l.bf16 %v4594_v57 }
 0x7f2   : > { %v2108_v55 = vsel %vm696_vm1, %v2107_v54, 0.0  ;;  %v4376_v2 = vpack.c.bf16 %v4596_v58, %v4595_v59 }
 0x7f3   : > { %2109 = vadd.xlane.f32.xlu1 %v2108_v55  ;;  %v2219_v19 = vpop.permute.xlu0 %2218 }
 0x7f4   : > { %4377 = vmatpush3.bf16.msra.mxu0 %v4376_v2 }
 0x7f5   : > { %4378 = vmatprep.subr.bf16.mxu0 %v5150_v0 }
 0x804   : > { %4598 = vrot.lane.b32.xlu1 %v4597_v56, %s5155_s1 }
 0x880   : > { %v2110_v3 = vpop.xlane.xlu1 %2109 }
 0x881   : > { %v2111_v5 = vmul.f32 0.03125, %v2110_v3 }
 0x883   : > { %v2112_v60 = vadd.f32 1e-05, %v2111_v5 }
 0x884   : > { %v4599_v61 = vpop.permute.xlu1 %4598 }
 0x885   : > { %4618 = vrsqrt.f32 %v2112_v60  ;;  %v4601_v62 = vunpack.i.h.bf16 %v4599_v61  ;;  %v4600_v63 = vunpack.i.l.bf16 %v4599_v61 }
 0x887   : > { %v4379_v9 = vpack.c.bf16 %v4601_v62, %v4600_v63 }
 0x889   : > { %4380 = vmatpush3.bf16.msra.mxu0 %v4379_v9 }
 0x88a   : > { %4286 = vmatprep.subr.mxu0 %v5152_v1 }
 0x88c   : > { %4274 = vmatmul.mubr.msk.f32.vlgmr.msra.gmra.mrb[8].mxu0 %vm696_vm1, %v679_v4 }
 0x88d   : > { %4288 = vmatprep.mubr.msk.f32.mxu0 %vm5151_vm0, %v5152_v1 }
 0x88f   : > { %v4619_v7 = vpop.eup %4618 }
 0x890   : > { %v2114_v12 = vmul.f32 %v4619_v7, %v2106_v53 }
 0x892   : > { %v2121_v14 = vmul.f32 %v4086_v11, %v2114_v12 }
 0x894   : > { %v2128_v17 = vadd.f32 %v4087_v13, %v2121_v14 }
 0x896   : > { %4263 = vmatmul.mubr.msk.f32.vlgmr.msra.gmra.mrb[12].mxu1 %vm696_vm1, %v2128_v17 }
 0x897   : > { %4278 = vmatprep.mubr.msk.f32.mxu1 %vm5151_vm0, %v5152_v1 }
 0x95f   : > { %v2290_v21 = vpop.f32.mrb[8].mxu0 }
 0x960   : > { %v2291_v20 = vadd.f32 %v2290_v21, %v2219_v19  ;;  %v4275_v22 = vpop.f32.mrb[9].mxu0 }
 0x962   : > { %2444 = vrot.lane.b32.xlu0 %v2291_v20, %s5156_s8  ;;  %2441 = vrot.lane.b32.xlu1 %v2291_v20, %s5154_s20 }
 0x966   : > { %2447 = vrot.lane.b32.xlu1 %v2291_v20, %s5153_s22 }
 0x969   : > { %v2198_v23 = vpop.f32.mrb[12].mxu1 }
 0x96a   : > { %v2199_v24 = vadd.f32 %v5722_v10, %v2198_v23  ;;  %v4264_v25 = vpop.f32.mrb[13].mxu1 }
 0x96c   : > { %2298 = vrot.lane.b32.xlu1 %v2199_v24, %s5156_s8  ;;  %2295 = vrot.lane.b32.xlu0 %v2199_v24, %s5154_s20  ;;  %s6068_s20 = scalar_lea.hbm %s6193_s29, %s4118_s25  ;;  %s5034_s8 = scalar_lea.vmem %s6070_s17, 128 }
 0x96d   : > { %p5035_p11 = scmp.ne.s32.totalorder %s6070_s17, %s5034_s8  ;;  %p5042_p1 = scmp.lt.s32.totalorder %s5040_s5, %s5034_s8 }
 0x96f   : > { %p5036_p9 = pnand %p5035_p11, %p6195_p8  ;;  %p5043_p3 = por %p5042_p1, %p5041_p13 }
 0x970   : > { %2301 = vrot.lane.b32.xlu0 %v2199_v24, %s5153_s22  ;;  %s6194_s22 = smov %s6193_s29 }
 0x971   : > { %p5037_p12 = pneg %p5036_p9 }
 0x973   : > { %p5044_p2 = pnand %p5043_p3, %p5037_p12 }
 0x974   : > { %2586 = vrot.lane.b32.xlu0 %v2291_v20, %s5155_s1 }
 0x9d4   : > { %v5921_v27 = vpop.permute.xlu0 %2444  ;;  %v2442_v28 = vpop.permute.xlu1 %2441 }
 0x9d5   : > { %2588 = vrot.lane.b32.xlu1 %v2442_v28, %s5155_s1  ;;  %v2450_v29 = vcombine.low %v2291_v20, %v5921_v27  ;;  %v2451_v30 = vcombine.high %v2291_v20, %v5921_v27 }
 0x9d7   : > { %v2458_v33 = vrot.slane %v2450_v29, %v5746_v26  ;;  %v2465_v35 = vrot.slane %v2451_v30, %v5746_v26 }
 0x9d8   : > { %v5926_v31 = vpop.permute.xlu1 %2447 }
 0x9d9   : > { %v2466_v10 = vcombine.low %v2442_v28, %v5926_v31  ;;  %v2467_v32 = vcombine.high %v2442_v28, %v5926_v31 }
 0x9db   : > { %v2474_v36 = vrot.slane %v2466_v10, %v5746_v26  ;;  %v2481_v38 = vrot.slane %v2467_v32, %v5746_v26 }
 0x9dd   : > { %v2482_v39 = vcombine.low %v2458_v33, %v2474_v36  ;;  %v2483_v40 = vcombine.high %v2458_v33, %v2474_v36  ;;  %v2498_v16 = vcombine.low %v2465_v35, %v2481_v38  ;;  %v2499_v6 = vcombine.high %v2465_v35, %v2481_v38 }
 0x9de   : > { %v2296_v8 = vpop.permute.xlu0 %2295  ;;  %v2299_v44 = vpop.permute.xlu1 %2298 }
 0x9df   : > { %v2490_v41 = vrot.slane %v2482_v39, %v5755_v34  ;;  %v2497_v15 = vrot.slane %v2483_v40, %v5755_v34  ;;  %v2506_v42 = vrot.slane %v2498_v16, %v5755_v34  ;;  %v2513_v43 = vrot.slane %v2499_v6, %v5755_v34 }
 0x9e0   : > { %v2304_v50 = vcombine.low %v2199_v24, %v2299_v44  ;;  %v2305_v51 = vcombine.high %v2199_v24, %v2299_v44 }
 0x9e1   : > { %v2518_v45 = vcombine.low %v2490_v41, %v2497_v15  ;;  %v4092_v47 = vcombine.high %v2490_v41, %v2497_v15  ;;  %v2534_v48 = vcombine.low %v2506_v42, %v2513_v43  ;;  %v4093_v49 = vcombine.high %v2506_v42, %v2513_v43 }
 0x9e2   : > { %v2302_v52 = vpop.permute.xlu0 %2301  ;;  %v2312_v60 = vrot.slane %v2304_v50, %v5746_v26  ;;  %v2319_v61 = vrot.slane %v2305_v51, %v5746_v26 }
 0x9e3   : > { %v2525_v53 = vrot.slane %v2518_v45, %v5746_v26  ;;  %v2533_v54 = vrot.slane %v4092_v47, %v5746_v26  ;;  %v2541_v55 = vrot.slane %v2534_v48, %v5746_v26  ;;  %v2549_v56 = vrot.slane %v4093_v49, %v5746_v26 }
 0x9e4   : > { %v2320_v57 = vcombine.low %v2296_v8, %v2302_v52  ;;  %v2321_v58 = vcombine.high %v2296_v8, %v2302_v52 }
 0x9e5   : > { %v2550_v59 = vcombine.low %v2525_v53, %v2533_v54  ;;  %v2551_v2 = vcombine.high %v2525_v53, %v2533_v54  ;;  %v2566_v3 = vcombine.low %v2541_v55, %v2549_v56  ;;  %v2567_v5 = vcombine.high %v2541_v55, %v2549_v56 }
 0x9e6   : > { %v2328_v62 = vrot.slane %v2320_v57, %v5746_v26  ;;  %v2335_v63 = vrot.slane %v2321_v58, %v5746_v26 }
 0x9e7   : > { %v2558_v9 = vrot.slane %v2550_v59, %v5755_v34  ;;  %v2574_v4 = vrot.slane %v2566_v3, %v5755_v34  ;;  %v2565_v7 = vrot.slane %v2551_v2, %v5755_v34  ;;  %v2581_v11 = vrot.slane %v2567_v5, %v5755_v34 }
 0x9e8   : > { %v2336_v12 = vcombine.low %v2312_v60, %v2328_v62  ;;  %v2337_v13 = vcombine.high %v2312_v60, %v2328_v62  ;;  %v2352_v14 = vcombine.low %v2319_v61, %v2335_v63  ;;  %v2353_v17 = vcombine.high %v2319_v61, %v2335_v63  ;;  %v2587_v61 = vpop.permute.xlu0 %2586 }
 0x9e9   : > { %v2582_v19 = vcombine.low %v2558_v9, %v2574_v4  ;;  %v2584_v21 = vcombine.low %v2565_v7, %v2581_v11  ;;  %v2583_v43 = vcombine.high %v2558_v9, %v2574_v4  ;;  %v2585_v45 = vcombine.high %v2565_v7, %v2581_v11 }
 0x9ea   : > { %v2344_v20 = vrot.slane %v2336_v12, %v5755_v34  ;;  %v2351_v22 = vrot.slane %v2337_v13, %v5755_v34  ;;  %v2360_v23 = vrot.slane %v2352_v14, %v5755_v34  ;;  %v2367_v24 = vrot.slane %v2353_v17, %v5755_v34 }
 0x9eb   : > { %4277 = vmatpush3.xpose.msk.msra.mxu1 %vm1212_vm2, %v2582_v19  ;;  %4287 = vmatpush3.xpose.msk.msra.mxu0 %vm1212_vm2, %v2584_v21 }
 0x9ec   : > { %v2372_v25 = vcombine.low %v2344_v20, %v2351_v22  ;;  %v4090_v28 = vcombine.high %v2344_v20, %v2351_v22  ;;  %v2388_v29 = vcombine.low %v2360_v23, %v2367_v24  ;;  %v4091_v30 = vcombine.high %v2360_v23, %v2367_v24  ;;  %4281 = vmatprep.subr.mxu1 %v5152_v1 }
 0x9ed   : > { %4296 = vmatprep.subr.mxu0 %v5152_v1 }
 0x9ee   : > { %v2379_v10 = vrot.slane %v2372_v25, %v5746_v26  ;;  %v2387_v32 = vrot.slane %v4090_v28, %v5746_v26  ;;  %v2395_v33 = vrot.slane %v2388_v29, %v5746_v26  ;;  %v2403_v35 = vrot.slane %v4091_v30, %v5746_v26 }
 0x9f0   : > { %v2404_v36 = vcombine.low %v2379_v10, %v2387_v32  ;;  %v2405_v38 = vcombine.high %v2379_v10, %v2387_v32  ;;  %v2420_v39 = vcombine.low %v2395_v33, %v2403_v35  ;;  %v2421_v40 = vcombine.high %v2395_v33, %v2403_v35 }
 0x9f2   : > { %v2412_v16 = vrot.slane %v2404_v36, %v5755_v34  ;;  %v2428_v6 = vrot.slane %v2420_v39, %v5755_v34  ;;  %v2419_v8 = vrot.slane %v2405_v38, %v5755_v34  ;;  %v2435_v41 = vrot.slane %v2421_v40, %v5755_v34 }
 0x9f4   : > { %v2436_v15 = vcombine.low %v2412_v16, %v2428_v6  ;;  %v2438_v42 = vcombine.low %v2419_v8, %v2435_v41  ;;  %v2437_v44 = vcombine.high %v2412_v16, %v2428_v6  ;;  %v2439_v47 = vcombine.high %v2419_v8, %v2435_v41 }
 0x9f6   : > { %4279 = vmatmul.mubr.msk.f32.vlgmr.msra.gmra.mrb[14].mxu1 %vm1212_vm2, %v2436_v15  ;;  %4289 = vmatmul.mubr.msk.f32.vlgmr.msra.gmra.mrb[10].mxu0 %vm1212_vm2, %v2438_v42 }
 0x9f7   : > { %4282 = vmatpush3.xpose.msk.msra.mxu1 %vm1212_vm2, %v2583_v43  ;;  %4283 = vmatprep.mubr.msk.f32.mxu1 %vm5151_vm0, %v5152_v1 }
 0x9f8   : > { %4291 = vmatprep.subr.mxu1 %v5152_v1  ;;  %4298 = vmatprep.mubr.msk.f32.mxu0 %vm5151_vm0, %v5152_v1 }
 0x9fa   : > { %4284 = vmatmul.mubr.msk.f32.vlgmr.msra.gmra.mrb[16].mxu1 %vm1212_vm2, %v2437_v44 }
 0x9fb   : > { %4292 = vmatpush3.xpose.msk.msra.mxu1 %vm1212_vm2, %v2585_v45  ;;  %4293 = vmatprep.mubr.msk.f32.mxu1 %vm5151_vm0, %v5152_v1 }
 0x9fc   : > { %4301 = vmatprep.subr.mxu1 %v5152_v1 }
 0x9fe   : > { %4294 = vmatmul.mubr.msk.f32.vlgmr.msra.gmra.mrb[18].mxu1 %vm1212_vm2, %v2439_v47 }
 0x9ff   : > { %4303 = vmatprep.mubr.msk.f32.mxu1 %vm5151_vm0, %v5152_v1 }
 0xa47   : > { %v2589_v62 = vpop.permute.xlu1 %2588 }
 0xac9   : > { %v2806_v48 = vpop.f32.mrb[14].mxu1  ;;  %v2958_v49 = vpop.f32.mrb[10].mxu0 }
 0xaca   : > { %v3038_v50 = vmul.f32 0.35355338, %v2806_v48  ;;  %v3040_v51 = vmul.f32 0.35355338, %v2958_v49  ;;  %v4280_v52 = vpop.f32.mrb[15].mxu1  ;;  %v4290_v53 = vpop.f32.mrb[11].mxu0 }
 0xacc   : > { %v3048_v54 = vsel %vm1212_vm2, %v3040_v51, -inf  ;;  %v3042_v55 = vsel %vm1212_vm2, %v3038_v50, -inf }
 0xacd   : > { %3049 = vmax.xlane.f32.xlu0 %v3048_v54  ;;  %3043 = vmax.xlane.f32.xlu1 %v3042_v55  ;;  %v2882_v56 = vpop.f32.mrb[16].mxu1 }
 0xace   : > { %v3039_v57 = vmul.f32 0.35355338, %v2882_v56  ;;  %v4285_v58 = vpop.f32.mrb[17].mxu1 }
 0xad0   : > { %v3045_v59 = vsel %vm1212_vm2, %v3039_v57, -inf }
 0xad1   : > { %3046 = vmax.xlane.f32.xlu0 %v3045_v59  ;;  %v3034_v2 = vpop.f32.mrb[18].mxu1 }
 0xad2   : > { %v3041_v3 = vmul.f32 0.35355338, %v3034_v2  ;;  %v4295_v5 = vpop.f32.mrb[19].mxu1 }
 0xad4   : > { %v3051_v60 = vsel %vm1212_vm2, %v3041_v3, -inf }
 0xad5   : > { %3052 = vmax.xlane.f32.xlu1 %v3051_v60 }
 0xae6   : > { %2590 = vrot.lane.b32.xlu1 %v5921_v27, %s5155_s1 }
 0xae7   : > { %2592 = vrot.lane.b32.xlu0 %v5926_v31, %s5155_s1  ;;  %s3807_s1 = scalar_lea.sflag [#allocation4], %s5644_s6 }
 0xb5a   : > { %v3050_v63 = vpop.xlane.xlu0 %3049  ;;  %v3044_v9 = vpop.xlane.xlu1 %3043 }
 0xb5b   : > { %v3054_v4 = vsub.f32 %v3038_v50, %v3044_v9  ;;  %v3056_v7 = vsub.f32 %v3040_v51, %v3050_v63 }
 0xb5d   : > { %v3058_v11 = vmul.f32 1.442695, %v3054_v4  ;;  %v3062_v14 = vmul.f32 1.442695, %v3056_v7 }
 0xb5e   : > { %v3047_v12 = vpop.xlane.xlu0 %3046 }
 0xb5f   : > { %v3055_v13 = vsub.f32 %v3039_v57, %v3047_v12  ;;  %4620 = vpow2.f32 %v3058_v11 }
 0xb61   : > { %v3060_v17 = vmul.f32 1.442695, %v3055_v13 }
 0xb62   : > { %v2593_v19 = vpop.permute.xlu0 %2592  ;;  %v3053_v21 = vpop.xlane.xlu1 %3052 }
 0xb63   : > { %4622 = vpow2.f32 %v3060_v17  ;;  %v3057_v20 = vsub.f32 %v3041_v3, %v3053_v21  ;;  %v2614_v27 = vcombine.low %v2589_v62, %v2593_v19  ;;  %v2615_v22 = vcombine.high %v2589_v62, %v2593_v19 }
 0xb64   : > { %4624 = vpow2.f32 %v3062_v14 }
 0xb65   : > { %v3064_v31 = vmul.f32 1.442695, %v3057_v20  ;;  %v2622_v28 = vrot.slane %v2614_v27, %v5746_v26  ;;  %v2629_v29 = vrot.slane %v2615_v22, %v5746_v26 }
 0xb66   : > { %v2591_v23 = vpop.permute.xlu1 %2590 }
 0xb67   : > { %4626 = vpow2.f32 %v3064_v31  ;;  %v2598_v24 = vcombine.low %v2587_v61, %v2591_v23  ;;  %v2599_v25 = vcombine.high %v2587_v61, %v2591_v23 }
 0xb69   : > { %v2606_v30 = vrot.slane %v2598_v24, %v5746_v26  ;;  %v2613_v10 = vrot.slane %v2599_v25, %v5746_v26  ;;  %v4621_v32 = vpop.eup %4620 }
 0xb6a   : > { %v3066_v39 = vsel %vm1212_vm2, %v4621_v32, 0.0 }
 0xb6b   : > { %v2630_v33 = vcombine.low %v2606_v30, %v2622_v28  ;;  %v2631_v35 = vcombine.high %v2606_v30, %v2622_v28  ;;  %v2646_v36 = vcombine.low %v2613_v10, %v2629_v29  ;;  %v2647_v38 = vcombine.high %v2613_v10, %v2629_v29  ;;  %3067 = vadd.xlane.f32.xlu1 %v3066_v39 }
 0xb6d   : > { %v4623_v40 = vpop.eup %4622  ;;  %v2638_v16 = vrot.slane %v2630_v33, %v5755_v34  ;;  %v2645_v6 = vrot.slane %v2631_v35, %v5755_v34  ;;  %v2654_v8 = vrot.slane %v2646_v36, %v5755_v34  ;;  %v2661_v41 = vrot.slane %v2647_v38, %v5755_v34 }
 0xb6e   : > { %v3069_v15 = vsel %vm1212_vm2, %v4623_v40, 0.0  ;;  %v4625_v42 = vpop.eup %4624 }
 0xb6f   : > { %v2666_v43 = vcombine.low %v2638_v16, %v2645_v6  ;;  %v4094_v44 = vcombine.high %v2638_v16, %v2645_v6  ;;  %v2682_v45 = vcombine.low %v2654_v8, %v2661_v41  ;;  %v4095_v47 = vcombine.high %v2654_v8, %v2661_v41  ;;  %3070 = vadd.xlane.f32.xlu0 %v3069_v15 }
 0xb70   : > { %v3072_v53 = vsel %vm1212_vm2, %v4625_v42, 0.0 }
 0xb71   : > { %v4627_v48 = vpop.eup %4626  ;;  %v2673_v49 = vrot.slane %v2666_v43, %v5746_v26  ;;  %v2681_v50 = vrot.slane %v4094_v44, %v5746_v26  ;;  %v2689_v51 = vrot.slane %v2682_v45, %v5746_v26  ;;  %v2697_v52 = vrot.slane %v4095_v47, %v5746_v26 }
 0xb72   : > { %v3075_v54 = vsel %vm1212_vm2, %v4627_v48, 0.0 }
 0xb73   : > { %3073 = vadd.xlane.f32.xlu0 %v3072_v53  ;;  %3076 = vadd.xlane.f32.xlu1 %v3075_v54  ;;  %v2698_v55 = vcombine.low %v2673_v49, %v2681_v50  ;;  %v2714_v56 = vcombine.low %v2689_v51, %v2697_v52  ;;  %v2699_v57 = vcombine.high %v2673_v49, %v2681_v50 }
 0xb74   : > { %v2715_v58 = vcombine.high %v2689_v51, %v2697_v52 }
 0xb75   : > { %v2706_v59 = vrot.slane %v2698_v55, %v5755_v34  ;;  %v2722_v2 = vrot.slane %v2714_v56, %v5755_v34  ;;  %v2713_v3 = vrot.slane %v2699_v57, %v5755_v34 }
 0xb76   : > { %v2729_v5 = vrot.slane %v2715_v58, %v5755_v34 }
 0xb77   : > { %v2730_v60 = vcombine.low %v2706_v59, %v2722_v2  ;;  %v2731_v61 = vcombine.high %v2706_v59, %v2722_v2 }
 0xb78   : > { %v2732_v62 = vcombine.low %v2713_v3, %v2729_v5  ;;  %v2733_v63 = vcombine.high %v2713_v3, %v2729_v5 }
 0xb79   : > { %4297 = vmatpush3.msra.mxu0 %v2730_v60  ;;  %4302 = vmatpush3.msra.mxu1 %v2731_v61 }
 0xb7a   : > { %4299 = vmatmul.mubr.msk.f32.vlgmr.msra.gmra.mrb[12].mxu0 %vm1212_vm2, %v4621_v32  ;;  %4304 = vmatmul.mubr.msk.f32.vlgmr.msra.gmra.mrb[20].mxu1 %vm1212_vm2, %v4623_v40 }
 0xb7b   : > { %4306 = vmatprep.subr.mxu0 %v5152_v1  ;;  %4311 = vmatprep.subr.mxu1 %v5152_v1 }
 0xb7c   : > { %4307 = vmatpush3.msra.mxu0 %v2732_v62  ;;  %4312 = vmatpush3.msra.mxu1 %v2733_v63 }
 0xb7d   : > { %4308 = vmatprep.mubr.msk.f32.mxu0 %vm5151_vm0, %v5152_v1  ;;  %4313 = vmatprep.mubr.msk.f32.mxu1 %vm5151_vm0, %v5152_v1 }
 0xb7e   : > { %4309 = vmatmul.mubr.msk.f32.vlgmr.msra.gmra.mrb[14].mxu0 %vm1212_vm2, %v4625_v42  ;;  %4314 = vmatmul.mubr.msk.f32.vlgmr.msra.gmra.mrb[22].mxu1 %vm1212_vm2, %v4627_v48 }
 0xb7f   : > { %4381 = vmatprep.subr.bf16.mxu0 %v5150_v0  ;;  %4324 = vmatprep.mubr.msk.f32.mxu0 %vm5151_vm0, %v5152_v1 }
 0xb80   : > { %4383 = vmatpush3.bf16.msra.mxu0 %v5856_v37  ;;  %4387 = vmatprep.subr.bf16.mxu1 %v5150_v0 }
 0xb81   : > { %4384 = vmatprep.subr.bf16.mxu0 %v5150_v0  ;;  %4335 = vmatprep.mubr.msk.f32.mxu1 %vm5151_vm0, %v5152_v1 }
 0xb84   : > { %4386 = vmatpush3.bf16.msra.mxu0 %v5868_v18 }
 0xb85   : > { %4393 = vmatprep.subr.bf16.mxu0 %v5150_v0 }
 0xbf8   : > { %v3068_v4 = vpop.xlane.xlu1 %3067 }
 0xbf9   : > { %4628 = vrcp.f32 %v3068_v4 }
 0xbfc   : > { %v3071_v9 = vpop.xlane.xlu0 %3070 }
 0xbfd   : > { %4630 = vrcp.f32 %v3071_v9 }
 0xc00   : > { %v3074_v7 = vpop.xlane.xlu0 %3073  ;;  %v3077_v11 = vpop.xlane.xlu1 %3076 }
 0xc01   : > { %4632 = vrcp.f32 %v3074_v7 }
 0xc02   : > { %4634 = vrcp.f32 %v3077_v11 }
 0xc03   : > { %v4629_v13 = vpop.eup %4628 }
 0xc07   : > { %v4631_v19 = vpop.eup %4630 }
 0xc0b   : > { %v4633_v21 = vpop.eup %4632 }
 0xc0c   : > { %v4635_v20 = vpop.eup %4634 }
 0xc4d   : > { %v3147_v37 = vpop.f32.mrb[12].mxu0  ;;  %v3220_v12 = vpop.f32.mrb[20].mxu1 }
 0xc4e   : > { %v4300_v14 = vpop.f32.mrb[13].mxu0  ;;  %v4305_v17 = vpop.f32.mrb[21].mxu1  ;;  %v3374_v22 = vmul.f32 %v4629_v13, %v3147_v37  ;;  %v3375_v31 = vmul.f32 %v4631_v19, %v3220_v12 }
 0xc51   : > { %v3293_v27 = vpop.f32.mrb[14].mxu0  ;;  %v3366_v18 = vpop.f32.mrb[22].mxu1 }
 0xc52   : > { %v3376_v23 = vmul.f32 %v4633_v21, %v3293_v27  ;;  %v3377_v24 = vmul.f32 %v4635_v20, %v3366_v18  ;;  %v4310_v25 = vpop.f32.mrb[15].mxu0  ;;  %v4315_v28 = vpop.f32.mrb[23].mxu1  ;;  %v3631_v21 = vld [vmem:[#allocation19] sm:$0xff]  ;;  %v3632_v20 = vld [vmem:[#allocation19 + $0x8] sm:$0xff]  ;;  %v3634_v18 = vld [vmem:[#allocation19 + $0x18] sm:$0xff] }
 0xc53   : > { %v4388_v27 = vpack.c.bf16 %v3632_v20, %v3631_v21  ;;  %v3719_v25 = vld [vmem:[#allocation22 + $0x18] sm:$0xff] }
 0xc54   : > { %v3378_v29 = vcombine.low %v3374_v22, %v3376_v23  ;;  %v3379_v30 = vcombine.high %v3374_v22, %v3376_v23  ;;  %v3394_v10 = vcombine.low %v3375_v31, %v3377_v24  ;;  %v3395_v32 = vcombine.high %v3375_v31, %v3377_v24  ;;  %v3716_v22 = vld [vmem:[#allocation22] sm:$0xff]  ;;  %v3717_v31 = vld [vmem:[#allocation22 + $0x8] sm:$0xff]  ;;  %v3718_v23 = vld [vmem:[#allocation22 + $0x10] sm:$0xff] }
 0xc55   : > { %4389 = vmatpush3.bf16.msra.mxu1 %v4388_v27  ;;  %v4394_v24 = vpack.c.bf16 %v3717_v31, %v3716_v22  ;;  %v4397_v28 = vpack.c.bf16 %v3719_v25, %v3718_v23 }
 0xc56   : > { %v3386_v33 = vrot.slane %v3378_v29, %v5746_v26  ;;  %v3393_v35 = vrot.slane %v3379_v30, %v5746_v26  ;;  %v3402_v36 = vrot.slane %v3394_v10, %v5746_v26  ;;  %v3409_v38 = vrot.slane %v3395_v32, %v5746_v26  ;;  %4390 = vmatprep.subr.bf16.mxu1 %v5150_v0  ;;  %v3720_v29 = vld [vmem:[#allocation22 + $0x20] sm:$0xff]  ;;  %v3721_v30 = vld [vmem:[#allocation22 + $0x28] sm:$0xff] }
 0xc57   : > { %v4400_v10 = vpack.c.bf16 %v3721_v30, %v3720_v29 }
 0xc58   : > { %v3410_v39 = vcombine.low %v3386_v33, %v3402_v36  ;;  %v3411_v40 = vcombine.high %v3386_v33, %v3402_v36  ;;  %v3426_v16 = vcombine.low %v3393_v35, %v3409_v38  ;;  %v3427_v6 = vcombine.high %v3393_v35, %v3409_v38  ;;  %v4111_v38 = vld [vmem:[#allocation16] ss:$0 sm:$0xff] }
 0xc5a   : > { %v3418_v8 = vrot.slane %v3410_v39, %v5755_v34  ;;  %v3425_v41 = vrot.slane %v3411_v40, %v5755_v34  ;;  %v3434_v15 = vrot.slane %v3426_v16, %v5755_v34  ;;  %v3441_v42 = vrot.slane %v3427_v6, %v5755_v34  ;;  %v4112_v40 = vld [vmem:[#allocation17] ss:$0 sm:$0xff] }
 0xc5c   : > { %v3446_v43 = vcombine.low %v3418_v8, %v3425_v41  ;;  %v4108_v44 = vcombine.high %v3418_v8, %v3425_v41  ;;  %v3462_v45 = vcombine.low %v3434_v15, %v3441_v42  ;;  %v4109_v47 = vcombine.high %v3434_v15, %v3441_v42  ;;  %v3722_v8 = vld [vmem:[#allocation22 + $0x30] sm:$0xff]  ;;  %v3723_v41 = vld [vmem:[#allocation22 + $0x38] sm:$0xff] }
 0xc5d   : > { %v4403_v15 = vpack.c.bf16 %v3723_v41, %v3722_v8  ;;  %v4113_v42 = vld [vmem:[#allocation20] ss:$0 sm:$0xff] }
 0xc5e   : > { %v3453_v48 = vrot.slane %v3446_v43, %v5746_v26  ;;  %v3461_v49 = vrot.slane %v4108_v44, %v5746_v26  ;;  %v3469_v50 = vrot.slane %v3462_v45, %v5746_v26  ;;  %v3477_v51 = vrot.slane %v4109_v47, %v5746_v26  ;;  %v4115_v47 = vld [vmem:[#allocation23] ss:$0 sm:$0xff] }
 0xc60   : > { %v3479_v52 = vcombine.high %v3453_v48, %v3461_v49  ;;  %v3495_v53 = vcombine.high %v3469_v50, %v3477_v51  ;;  %v3478_v54 = vcombine.low %v3453_v48, %v3461_v49  ;;  %v3494_v55 = vcombine.low %v3469_v50, %v3477_v51 }
 0xc62   : > { %v3493_v56 = vrot.slane %v3479_v52, %v5755_v34  ;;  %v3509_v57 = vrot.slane %v3495_v53, %v5755_v34  ;;  %v3486_v58 = vrot.slane %v3478_v54, %v5755_v34  ;;  %v3502_v59 = vrot.slane %v3494_v55, %v5755_v34 }
 0xc64   : > { %v3512_v2 = vcombine.low %v3493_v56, %v3509_v57  ;;  %v3511_v3 = vcombine.high %v3486_v58, %v3502_v59  ;;  %v3513_v5 = vcombine.high %v3493_v56, %v3509_v57  ;;  %v3510_v60 = vcombine.low %v3486_v58, %v3502_v59 }
 0xc66   : > { %3519 = vrot.lane.b32.xlu1 %v3512_v2, %s5160_s18  ;;  %3515 = vrot.lane.b32.xlu0 %v3511_v3, %s5161_s21 }
 0xc6a   : > { %3523 = vrot.lane.b32.xlu1 %v3513_v5, %s5162_s0 }
 0xcd8   : > { %v3520_v26 = vpop.permute.xlu1 %3519  ;;  %v3516_v61 = vpop.permute.xlu0 %3515 }
 0xcd9   : > { %v3526_v62 = vsel %vm1212_vm2, %v3510_v60, %v3516_v61 }
 0xcda   : > { %v3527_v9 = vsel %vm2016_vm4, %v3526_v62, %v3520_v26 }
 0xcdc   : > { %v3524_v63 = vpop.permute.xlu1 %3523 }
 0xcdd   : > { %v3528_v4 = vsel %vm2018_vm5, %v3527_v9, %v3524_v63 }
 0xcde   : > { %4325 = vmatmul.mubr.msk.f32.vlgmr.msra.gmra.mrb[16].mxu0 %vm696_vm1, %v3528_v4 }
 0xcdf   : > { %4354 = vmatprep.mubr.msk.f32.mxu0 %vm5151_vm0, %v5152_v1  ;;  %v3633_v1 = vld [vmem:[#allocation19 + $0x10] sm:$0xff]  ;;  %4395 = vmatpush3.bf16.msra.mxu0 %v4394_v24 }
 0xce0   : > { %4396 = vmatprep.subr.bf16.mxu0 %v5150_v0 }
 0xce3   : > { %4398 = vmatpush3.bf16.msra.mxu0 %v4397_v28 }
 0xce4   : > { %4399 = vmatprep.subr.bf16.mxu0 %v5150_v0 }
 0xce7   : > { %4401 = vmatpush3.bf16.msra.mxu0 %v4400_v10 }
 0xce8   : > { %4402 = vmatprep.subr.bf16.mxu0 %v5150_v0 }
 0xceb   : > { %4404 = vmatpush3.bf16.msra.mxu0 %v4403_v15 }
 0xdb1   : > { %v3598_v34 = vpop.f32.mrb[16].mxu0 }
 0xdb2   : > { %v3599_v7 = vadd.f32 %v5889_v46, %v3598_v34  ;;  %v4326_v11 = vpop.f32.mrb[17].mxu0  ;;  %v4391_v46 = vpack.c.bf16 %v3634_v18, %v3633_v1 }
 0xdb4   : > { %v3604_v37 = vsel %vm696_vm1, %v3599_v7, 0.0  ;;  %4392 = vmatpush3.bf16.msra.mxu1 %v4391_v46 }
 0xdb5   : > { %3605 = vadd.xlane.f32.xlu0 %v3604_v37 }
 0xe42   : > { %v3606_v12 = vpop.xlane.xlu0 %3605 }
 0xe43   : > { %v3607_v13 = vmul.f32 0.03125, %v3606_v12 }
 0xe45   : > { %v3608_v14 = vsub.f32 %v3599_v7, %v3607_v13 }
 0xe47   : > { %v3609_v17 = vmul.f32 %v3608_v14, %v3608_v14 }
 0xe49   : > { %v3610_v19 = vsel %vm696_vm1, %v3609_v17, 0.0 }
 0xe4a   : > { %3611 = vadd.xlane.f32.xlu1 %v3610_v19 }
 0xed7   : > { %v3612_v32 = vpop.xlane.xlu1 %3611 }
 0xed8   : > { %v3613_v33 = vmul.f32 0.03125, %v3612_v32 }
 0xeda   : > { %v3614_v35 = vadd.f32 1e-05, %v3613_v33 }
 0xedc   : > { %4636 = vrsqrt.f32 %v3614_v35 }
 0xee6   : > { %v4637_v36 = vpop.eup %4636 }
 0xee7   : > { %v3616_v39 = vmul.f32 %v4637_v36, %v3608_v14 }
 0xee9   : > { %v3623_v16 = vmul.f32 %v4111_v38, %v3616_v39 }
 0xeeb   : > { %v3630_v6 = vadd.f32 %v4112_v40, %v3623_v16 }
 0xeed   : > { %4336 = vmatmul.mubr.msk.f32.vlgmr.msra.gmra.mrb[24].mxu1 %vm696_vm1, %v3630_v6 }
 0xfc0   : > { %v3711_v0 = vpop.f32.mrb[24].mxu1 }
 0xfc1   : > { %v3712_v43 = vadd.f32 %v4113_v42, %v3711_v0  ;;  %v4337_v44 = vpop.f32.mrb[25].mxu1 }
 0xfc3   : > { %v3715_v45 = vmax.f32 %v3712_v43, 0.0 }
 0xfc5   : > { %4355 = vmatmul.mubr.msk.f32.vlgmr.msra.gmra.mrb[18].mxu0 %vm3731_vm6, %v3715_v45 }
0x1098   : > { %v3801_v48 = vpop.f32.mrb[18].mxu0 }
0x1099   : > { %v3802_v49 = vadd.f32 %v4115_v47, %v3801_v48  ;;  %v4356_v50 = vpop.f32.mrb[19].mxu0 }
0x109b   : > { %3805 = vst.msk [vmem:[%s677_s3] sm:$0xff] %vm696_vm1, %v3802_v49 }
0x109c   : > { %5047 = shalt.err (!%p5044_p2)
}
0x109d   : > { %s5048_s6 = scalar_lea.hbm %s6068_s20, 128  ;;  %s5052_s0 = scalar_lea.hbm %s6194_s22, 256 }
0x109e   : > { %p5049_p4 = scmp.ne.s32.totalorder %s6068_s20, %s5048_s6  ;;  %p5053_p7 = scmp.lt.u32.totalorder %s6068_s20, %s6194_s22 }
0x109f   : > { %p5054_p0 = scmp.lt.u32.totalorder %s5052_s0, %s5048_s6  ;;  %p5056_p11 = scmp.lt.u32.totalorder %s5048_s6, %s6068_s20 }
0x10a0   : > { %p5050_p10 = pnand %p5049_p4, %p6195_p8 }
0x10a1   : > { %p5055_p6 = por %p5054_p0, %p5053_p7 }
0x10a2   : > { %p5051_p5 = pneg %p5050_p10 }
0x10a3   : > { %p5057_p9 = por %p5056_p11, %p5055_p6 }
0x10a5   : > { %p5058_p12 = pnand %p5057_p9, %p5051_p5 }
0x10a7   : > { %5061 = shalt.err (!%p5058_p12)
}
0x10a8   : > { %4457 = dma.vmem_to_hbm [thread:$0]  (%p6195_p8), %s6070_s17, 128, %s6068_s20, %s3807_s1  }
0x10a9 PF: > { %s6196_s26 = sld [smem:[#allocation36_spill]]  ;;  %p6197_p13 = scmp.ne.s32.totalorder %s6171_s14, 0 }
0x10aa   : > { %p6198_p1 = scmp.ge.s32.totalorder %s5132_s16, 2 }
0x10ac   : > { %p4504_p3 = pnand %p6198_p1, %p6197_p13 }
0x10af   : > { %s3832_s7 = sand.u32 1, %s6196_s26  }
0x10b0   : > { %s3833_s29 = scalar_lea.sflag [#allocation4], %s3832_s7 }
0x10b1   : > { %5115 = dma.done.wait (!%p4504_p3), %s3833_s29, 128  }
0x10b2   : > { %5117 = vsyncadd (!%p4504_p3), %s3833_s29, 4294967168  ;;  %p36_p2 = scmp.ge.s32.totalorder %s5537_s23, 4   ;;  %s6199_s29 = smov %s5124_s30 }
0x10b3   : > { %s6200_s30 = smov %s5128_s15  ;;  %s6201_s15 = smov %s5548_s27 }
0x10b4   : > { %s6202_s16 = smov %s5537_s23  ;;  %38 = sbr.rel (!%p36_p2) target bundleno = 24 (0x18), region = 182 }
0x10bb   :  { %3838 = vsyncpa [#allocation3], 1 }
0x10bc   :  { %3840 = vsyncpa [#allocation3 + $0x1], 1 }
0x10bd   :  { %3841 = vsyncpa [#allocation6], 1 }
0x10be   :  { %3843 = vsyncpa [#allocation6 + $0x1], 1 }
0x10bf   :  { %3844 = vsyncpa [#allocation9], 1 }
0x10c0   :  { %3845 = vsyncpa [#allocation12], 1 }
0x10c1   :  { %3846 = vsyncpa [#allocation15], 1 }
0x10c2   :  { %3847 = vsyncpa [#allocation18], 1 }
0x10c3   :  { %3848 = vsyncpa [#allocation21], 1 }
0x10c4   :  { %3849 = vsyncpa [#allocation24], 1 }
0x10c5   :  { %3850 = vsyncpa [#allocation4], 1 }
0x10c6   :  { %3852 = vsyncpa [#allocation4 + $0x1], 1 }

</bundles_post_ra>
